<compile_context>
chip_gen: v7x
topology: tpu7x:2x2x1
jax: 0.10.0
libtpu: 0.0.40
codegen_flags: <defaults>
</compile_context>

<pallas_src>
import functools

import jax
import jax.numpy as jnp
from jax.experimental import pallas as pl
from jax.experimental.pallas import tpu as pltpu


def _round_up(n, m=128):
    return ((n + m - 1) // m) * m


# ----------------------------------------------------------------------------
# Pallas kernels
# ----------------------------------------------------------------------------
def _conv_block_kernel(x_ref, w_ref, b_ref, o_ref, y_ref, *, lout, lh, taps):
    """Fused Conv1d(k=7, s=2, p=3) + bias + ReLU + MaxPool1d(2, 2).

    One grid step == one batch element (batch axis squeezed out of the refs).
      x_ref: (Lp, Cin_p)          time pre-padded by 3 each side, channel-padded
      w_ref: (taps, Cin_p, Cout_p) w_ref[k, ci, co] == torch_w[co, ci, k]
      b_ref: (1, Cout_p)
      o_ref: (Lh, Cout_p)          pooled output
      y_ref: (Lout, Cout_p) f32 VMEM scratch (pre-pool conv activations)
    """
    # conv as 7 shifted, stride-2 taps -> 7 MXU matmuls into one f32 accumulator
    acc = jnp.dot(
        x_ref[pl.ds(0, lout, stride=2), :],
        w_ref[0],
        preferred_element_type=jnp.float32,
    )
    for k in range(1, taps):  # static -> unrolled
        acc = acc + jnp.dot(
            x_ref[pl.ds(k, lout, stride=2), :],
            w_ref[k],
            preferred_element_type=jnp.float32,
        )
    # bias + ReLU epilogue, stash pre-pool activations in VMEM scratch
    y_ref[...] = jnp.maximum(acc + b_ref[...], 0.0)
    # MaxPool1d(kernel=2, stride=2) over time (floor semantics)
    o_ref[...] = jnp.maximum(
        y_ref[pl.ds(0, lh, stride=2), :],
        y_ref[pl.ds(1, lh, stride=2), :],
    ).astype(o_ref.dtype)


def _fc_kernel(x_ref, w_ref, b_ref, o_ref):
    """o = x @ w + b  (flatten/transpose already folded into w)."""
    o_ref[...] = (
        jnp.dot(x_ref[...], w_ref[...], preferred_element_type=jnp.float32)
        + b_ref[...]
    ).astype(o_ref.dtype)


# ----------------------------------------------------------------------------
# Pallas wrappers
# ----------------------------------------------------------------------------
def conv_relu_pool_block(x, w_taps, b_row, *, pad=3):
    """x: (B, L, Cin_p) channel-last, channels already 128-padded."""
    B, L, cin_p = x.shape
    taps, _, cout_p = w_taps.shape
    lout = (L + 1) // 2          # Conv1d(k=7, s=2, p=3) output length
    lh = lout // 2               # MaxPool1d(2, 2) output length
    lp = L + 2 * pad
    xp = jnp.pad(x, ((0, 0), (pad, pad), (0, 0)))  # halo only (cheap, small)

    kern = functools.partial(_conv_block_kernel, lout=lout, lh=lh, taps=taps)
    return pl.pallas_call(
        kern,
        out_shape=jax.ShapeDtypeStruct((B, lh, cout_p), jnp.float32),
        grid=(B,),
        in_specs=[
            pl.BlockSpec((None, lp, cin_p), lambda i: (i, 0, 0)),
            pl.BlockSpec((taps, cin_p, cout_p), lambda i: (0, 0, 0)),
            pl.BlockSpec((1, cout_p), lambda i: (0, 0)),
        ],
        out_specs=pl.BlockSpec((None, lh, cout_p), lambda i: (i, 0, 0)),
        scratch_shapes=[pltpu.VMEM((lout, cout_p), jnp.float32)],
        compiler_params=pltpu.CompilerParams(
            dimension_semantics=("parallel",)
        ),
    )(xp, w_taps, b_row)


def fc_pallas(x2, w2, b_row):
    M, K = x2.shape
    _, N = w2.shape
    return pl.pallas_call(
        _fc_kernel,
        out_shape=jax.ShapeDtypeStruct((M, N), jnp.float32),
        grid=(1,),
        in_specs=[
            pl.BlockSpec((M, K), lambda i: (0, 0)),
            pl.BlockSpec((K, N), lambda i: (0, 0)),
            pl.BlockSpec((1, N), lambda i: (0, 0)),
        ],
        out_specs=pl.BlockSpec((M, N), lambda i: (0, 0)),
    )(x2, w2, b_row)


# ----------------------------------------------------------------------------
# Parameter preparation (one-time weight reshuffle / padding, plain JAX)
# ----------------------------------------------------------------------------
def prepare_params(p, *, c_in, c_hid, latent, t_final):
    cin_p = _round_up(c_in)
    ch_p = _round_up(c_hid)
    lat_p = _round_up(latent)

    def conv(w, b, cin_pad):
        cout, cin, k = w.shape
        wt = jnp.transpose(w, (2, 1, 0))                      # (K, Cin, Cout)
        wt = jnp.pad(wt, ((0, 0), (0, cin_pad - cin), (0, ch_p - cout)))
        bp = jnp.pad(b, (0, ch_p - cout))[None, :]
        return wt.astype(jnp.float32), bp.astype(jnp.float32)

    conv_params = [
        conv(p["conv1_w"], p["conv1_b"], cin_p),
        conv(p["conv2_w"], p["conv2_b"], ch_p),
        conv(p["conv3_w"], p["conv3_b"], ch_p),
    ]

    # fc: fold torch's transpose(1,2)+flatten (index = c*T + t) and the channel
    # padding into the weight so the kernel eats the channel-last activation
    # flattened row-major as (t*C_pad + c).
    latent_dim, flat = p["fc_w"].shape
    assert flat == c_hid * t_final
    wf = p["fc_w"].reshape(latent_dim, c_hid, t_final)        # [l, c, t]
    wf = jnp.transpose(wf, (2, 1, 0))                         # [t, c, l]
    wf = jnp.pad(wf, ((0, 0), (0, ch_p - c_hid), (0, lat_p - latent_dim)))
    wf = wf.reshape(t_final * ch_p, lat_p).astype(jnp.float32)
    bf = jnp.pad(p["fc_b"], (0, lat_p - latent_dim))[None, :].astype(jnp.float32)

    return dict(conv=conv_params, fc=(wf, bf),
                cin_p=cin_p, ch_p=ch_p, latent=latent_dim)


# ----------------------------------------------------------------------------
# Encoder forward
# ----------------------------------------------------------------------------
def encoder_forward(x, prepared):
    """x: (B, L, C_in) float32 — same layout torch receives pre-transpose."""
    B, L, c_in = x.shape
    h = jnp.pad(x, ((0, 0), (0, 0), (0, prepared["cin_p"] - c_in)))
    for w_taps, b_row in prepared["conv"]:
        h = conv_relu_pool_block(h, w_taps, b_row)
    # SelfAttention over x.unsqueeze(1): softmax over the size-1 axis == 1, so
    # the attention-pooled output equals its input exactly -> dropped (dead
    # compute; identical to torch for finite activations).
    B_, T, ch_p = h.shape
    wf, bf = prepared["fc"]
    hf = h.reshape(B_, T * ch_p)                 # contiguous, no data movement
    out_p = fc_pallas(hf, wf, bf)
    return out_p[:, : prepared["latent"]]


# ----------------------------------------------------------------------------
# Deterministic synthetic parameters (shapes mirror the torch module)
# ----------------------------------------------------------------------------
def init_params(key, c_in, c_hid, latent, flat_dim, K=7):
    ks = jax.random.split(key, 12)

    def n(k, shape, scale=0.1):
        return scale * jax.random.normal(k, shape, dtype=jnp.float32)

    return dict(
        conv1_w=n(ks[0], (c_hid, c_in, K)), conv1_b=n(ks[1], (c_hid,)),
        conv2_w=n(ks[2], (c_hid, c_hid, K)), conv2_b=n(ks[3], (c_hid,)),
        conv3_w=n(ks[4], (c_hid, c_hid, K)), conv3_b=n(ks[5], (c_hid,)),
        # attention params kept for module parity; unused (exact identity op)
        attn_w1=n(ks[6], (c_hid, c_hid)), attn_b1=n(ks[7], (c_hid,)),
        attn_w2=n(ks[8], (1, c_hid)), attn_b2=n(ks[9], (1,)),
        fc_w=n(ks[10], (latent, flat_dim)), fc_b=n(ks[11], (latent,)),
    )


# Pure-JAX reference of the torch forward (for a sanity check only)
def _reference_forward(x, p):
    def conv_block(h, w, b):
        B, L, _ = h.shape
        cout, _, K = w.shape
        lout = (L + 1) // 2
        hp = jnp.pad(h, ((0, 0), (3, 3), (0, 0)))
        patches = jnp.stack(
            [hp[:, k: k + 2 * (lout - 1) + 1: 2, :] for k in range(K)], axis=2
        )  # (B, lout, K, Cin)
        y = jnp.einsum("blkc,ock->blo", patches, w) + b
        y = jnp.maximum(y, 0.0)
        lh = lout // 2
        return jnp.max(y[:, : lh * 2, :].reshape(B, lh, 2, cout), axis=2)

    h = conv_block(x, p["conv1_w"], p["conv1_b"])
    h = conv_block(h, p["conv2_w"], p["conv2_b"])
    h = conv_block(h, p["conv3_w"], p["conv3_b"])
    B, T, C = h.shape
    hf = jnp.transpose(h, (0, 2, 1)).reshape(B, C * T)   # identity attention
    return hf @ p["fc_w"].T + p["fc_b"]


if __name__ == "__main__":
    # Small shapes consistent with the module's arithmetic:
    # L=128 -> (conv k7 s2 p3 + pool 2) x3 -> T=2 ; flatten_dim = c_hid * T
    B, L, C_IN, C_HID, LATENT = 2, 128, 6, 8, 16

    t = L
    for _ in range(3):
        t = (t + 1) // 2       # conv k=7 s=2 p=3
        t = t // 2             # maxpool k=2 s=2
    FLAT = C_HID * t           # = 16 here (220*18 = 3960 at original sizes)

    key = jax.random.PRNGKey(0)
    kx, kp = jax.random.split(key)
    x = jax.random.normal(kx, (B, L, C_IN), dtype=jnp.float32)
    params = init_params(kp, C_IN, C_HID, LATENT, FLAT)
    prepared = prepare_params(params, c_in=C_IN, c_hid=C_HID,
                              latent=LATENT, t_final=t)

    fwd = jax.jit(lambda xx: encoder_forward(xx, prepared))
    out = jax.block_until_ready(fwd(x))
    assert out.shape == (B, LATENT) and out.dtype == jnp.float32

    ref = jax.block_until_ready(_reference_forward(x, params))
    max_err = float(jnp.max(jnp.abs(out - ref)))
    assert jnp.allclose(out, ref, atol=1e-2, rtol=1e-2), max_err

    print("KERNEL_OK")
</pallas_src>

<mosaic_0001>
module attributes {stable_mosaic.version = 11 : i64} {
  func.func @_conv_block_kernel(%arg0: i32, %arg1: memref<1x134x128xf32, #tpu.memory_space<vmem>>, %arg2: memref<7x128x128xf32, #tpu.memory_space<vmem>>, %arg3: memref<1x128xf32, #tpu.memory_space<vmem>>, %arg4: memref<1x32x128xf32, #tpu.memory_space<vmem>>, %arg5: memref<64x128xf32, #tpu.memory_space<vmem>>) attributes {dimension_semantics = [#tpu.dimension_semantics<parallel>], iteration_bounds = array<i64: 2>, scalar_prefetch = 0 : i64, scratch_operands = 1 : i64, tpu.core_type = #tpu.core_type<tc>, window_params = [{transform_indices = @transform_0, window_bounds = array<i64: 1, 134, 128>}, {pipeline_mode = #tpu.pipeline_mode<synchronous>, transform_indices = @transform_1, window_bounds = array<i64: 7, 128, 128>}, {pipeline_mode = #tpu.pipeline_mode<synchronous>, transform_indices = @transform_2, window_bounds = array<i64: 1, 128>}, {transform_indices = @transform_3, window_bounds = array<i64: 1, 32, 128>}]} {
    %c0 = arith.constant 0 : index
    %c0_0 = arith.constant 0 : index
    %c0_1 = arith.constant 0 : index
    %0 = tpu.strided_load %arg1[%c0, %c0_0, %c0_1] {strides = array<i32: 1, 2, 1>} : memref<1x134x128xf32, #tpu.memory_space<vmem>>, vector<1x64x128xf32>
    %1 = vector.shape_cast %0 : vector<1x64x128xf32> to vector<64x128xf32>
    %c0_2 = arith.constant 0 : index
    %c0_3 = arith.constant 0 : index
    %c0_4 = arith.constant 0 : index
    %2 = vector.load %arg2[%c0_2, %c0_3, %c0_4] : memref<7x128x128xf32, #tpu.memory_space<vmem>>, vector<1x128x128xf32>
    %3 = vector.shape_cast %2 : vector<1x128x128xf32> to vector<128x128xf32>
    %cst = arith.constant dense<0.000000e+00> : vector<64x128xf32>
    %4 = tpu.matmul %1, %3, %cst {dimension_numbers = #tpu.dot_dimension_numbers<[1], [0], [0], [1], [0, 0, 1, 1], [], []>} : vector<64x128xf32>, vector<128x128xf32>, vector<64x128xf32> -> vector<64x128xf32>
    %c0_5 = arith.constant 0 : index
    %c1 = arith.constant 1 : index
    %c0_6 = arith.constant 0 : index
    %5 = tpu.strided_load %arg1[%c0_5, %c1, %c0_6] {strides = array<i32: 1, 2, 1>} : memref<1x134x128xf32, #tpu.memory_space<vmem>>, vector<1x64x128xf32>
    %6 = vector.shape_cast %5 : vector<1x64x128xf32> to vector<64x128xf32>
    %c1_7 = arith.constant 1 : index
    %c0_8 = arith.constant 0 : index
    %c0_9 = arith.constant 0 : index
    %7 = vector.load %arg2[%c1_7, %c0_8, %c0_9] : memref<7x128x128xf32, #tpu.memory_space<vmem>>, vector<1x128x128xf32>
    %8 = vector.shape_cast %7 : vector<1x128x128xf32> to vector<128x128xf32>
    %cst_10 = arith.constant dense<0.000000e+00> : vector<64x128xf32>
    %9 = tpu.matmul %6, %8, %cst_10 {dimension_numbers = #tpu.dot_dimension_numbers<[1], [0], [0], [1], [0, 0, 1, 1], [], []>} : vector<64x128xf32>, vector<128x128xf32>, vector<64x128xf32> -> vector<64x128xf32>
    %10 = arith.addf %4, %9 : vector<64x128xf32>
    %c0_11 = arith.constant 0 : index
    %c2 = arith.constant 2 : index
    %c0_12 = arith.constant 0 : index
    %11 = tpu.strided_load %arg1[%c0_11, %c2, %c0_12] {strides = array<i32: 1, 2, 1>} : memref<1x134x128xf32, #tpu.memory_space<vmem>>, vector<1x64x128xf32>
    %12 = vector.shape_cast %11 : vector<1x64x128xf32> to vector<64x128xf32>
    %c2_13 = arith.constant 2 : index
    %c0_14 = arith.constant 0 : index
    %c0_15 = arith.constant 0 : index
    %13 = vector.load %arg2[%c2_13, %c0_14, %c0_15] : memref<7x128x128xf32, #tpu.memory_space<vmem>>, vector<1x128x128xf32>
    %14 = vector.shape_cast %13 : vector<1x128x128xf32> to vector<128x128xf32>
    %cst_16 = arith.constant dense<0.000000e+00> : vector<64x128xf32>
    %15 = tpu.matmul %12, %14, %cst_16 {dimension_numbers = #tpu.dot_dimension_numbers<[1], [0], [0], [1], [0, 0, 1, 1], [], []>} : vector<64x128xf32>, vector<128x128xf32>, vector<64x128xf32> -> vector<64x128xf32>
    %16 = arith.addf %10, %15 : vector<64x128xf32>
    %c0_17 = arith.constant 0 : index
    %c3 = arith.constant 3 : index
    %c0_18 = arith.constant 0 : index
    %17 = tpu.strided_load %arg1[%c0_17, %c3, %c0_18] {strides = array<i32: 1, 2, 1>} : memref<1x134x128xf32, #tpu.memory_space<vmem>>, vector<1x64x128xf32>
    %18 = vector.shape_cast %17 : vector<1x64x128xf32> to vector<64x128xf32>
    %c3_19 = arith.constant 3 : index
    %c0_20 = arith.constant 0 : index
    %c0_21 = arith.constant 0 : index
    %19 = vector.load %arg2[%c3_19, %c0_20, %c0_21] : memref<7x128x128xf32, #tpu.memory_space<vmem>>, vector<1x128x128xf32>
    %20 = vector.shape_cast %19 : vector<1x128x128xf32> to vector<128x128xf32>
    %cst_22 = arith.constant dense<0.000000e+00> : vector<64x128xf32>
    %21 = tpu.matmul %18, %20, %cst_22 {dimension_numbers = #tpu.dot_dimension_numbers<[1], [0], [0], [1], [0, 0, 1, 1], [], []>} : vector<64x128xf32>, vector<128x128xf32>, vector<64x128xf32> -> vector<64x128xf32>
    %22 = arith.addf %16, %21 : vector<64x128xf32>
    %c0_23 = arith.constant 0 : index
    %c4 = arith.constant 4 : index
    %c0_24 = arith.constant 0 : index
    %23 = tpu.strided_load %arg1[%c0_23, %c4, %c0_24] {strides = array<i32: 1, 2, 1>} : memref<1x134x128xf32, #tpu.memory_space<vmem>>, vector<1x64x128xf32>
    %24 = vector.shape_cast %23 : vector<1x64x128xf32> to vector<64x128xf32>
    %c4_25 = arith.constant 4 : index
    %c0_26 = arith.constant 0 : index
    %c0_27 = arith.constant 0 : index
    %25 = vector.load %arg2[%c4_25, %c0_26, %c0_27] : memref<7x128x128xf32, #tpu.memory_space<vmem>>, vector<1x128x128xf32>
    %26 = vector.shape_cast %25 : vector<1x128x128xf32> to vector<128x128xf32>
    %cst_28 = arith.constant dense<0.000000e+00> : vector<64x128xf32>
    %27 = tpu.matmul %24, %26, %cst_28 {dimension_numbers = #tpu.dot_dimension_numbers<[1], [0], [0], [1], [0, 0, 1, 1], [], []>} : vector<64x128xf32>, vector<128x128xf32>, vector<64x128xf32> -> vector<64x128xf32>
    %28 = arith.addf %22, %27 : vector<64x128xf32>
    %c0_29 = arith.constant 0 : index
    %c5 = arith.constant 5 : index
    %c0_30 = arith.constant 0 : index
    %29 = tpu.strided_load %arg1[%c0_29, %c5, %c0_30] {strides = array<i32: 1, 2, 1>} : memref<1x134x128xf32, #tpu.memory_space<vmem>>, vector<1x64x128xf32>
    %30 = vector.shape_cast %29 : vector<1x64x128xf32> to vector<64x128xf32>
    %c5_31 = arith.constant 5 : index
    %c0_32 = arith.constant 0 : index
    %c0_33 = arith.constant 0 : index
    %31 = vector.load %arg2[%c5_31, %c0_32, %c0_33] : memref<7x128x128xf32, #tpu.memory_space<vmem>>, vector<1x128x128xf32>
    %32 = vector.shape_cast %31 : vector<1x128x128xf32> to vector<128x128xf32>
    %cst_34 = arith.constant dense<0.000000e+00> : vector<64x128xf32>
    %33 = tpu.matmul %30, %32, %cst_34 {dimension_numbers = #tpu.dot_dimension_numbers<[1], [0], [0], [1], [0, 0, 1, 1], [], []>} : vector<64x128xf32>, vector<128x128xf32>, vector<64x128xf32> -> vector<64x128xf32>
    %34 = arith.addf %28, %33 : vector<64x128xf32>
    %c0_35 = arith.constant 0 : index
    %c6 = arith.constant 6 : index
    %c0_36 = arith.constant 0 : index
    %35 = tpu.strided_load %arg1[%c0_35, %c6, %c0_36] {strides = array<i32: 1, 2, 1>} : memref<1x134x128xf32, #tpu.memory_space<vmem>>, vector<1x64x128xf32>
    %36 = vector.shape_cast %35 : vector<1x64x128xf32> to vector<64x128xf32>
    %c6_37 = arith.constant 6 : index
    %c0_38 = arith.constant 0 : index
    %c0_39 = arith.constant 0 : index
    %37 = vector.load %arg2[%c6_37, %c0_38, %c0_39] : memref<7x128x128xf32, #tpu.memory_space<vmem>>, vector<1x128x128xf32>
    %38 = vector.shape_cast %37 : vector<1x128x128xf32> to vector<128x128xf32>
    %cst_40 = arith.constant dense<0.000000e+00> : vector<64x128xf32>
    %39 = tpu.matmul %36, %38, %cst_40 {dimension_numbers = #tpu.dot_dimension_numbers<[1], [0], [0], [1], [0, 0, 1, 1], [], []>} : vector<64x128xf32>, vector<128x128xf32>, vector<64x128xf32> -> vector<64x128xf32>
    %40 = arith.addf %34, %39 : vector<64x128xf32>
    %c0_41 = arith.constant 0 : index
    %c0_42 = arith.constant 0 : index
    %41 = vector.load %arg3[%c0_41, %c0_42] : memref<1x128xf32, #tpu.memory_space<vmem>>, vector<1x128xf32>
    %42 = vector.broadcast %41 : vector<1x128xf32> to vector<64x128xf32>
    %43 = arith.addf %40, %42 : vector<64x128xf32>
    %cst_43 = arith.constant 0.000000e+00 : f32
    %44 = vector.broadcast %cst_43 : f32 to vector<64x128xf32>
    %45 = arith.maximumf %43, %44 : vector<64x128xf32>
    %c0_44 = arith.constant 0 : index
    %c0_45 = arith.constant 0 : index
    %46 = vector.load %arg5[%c0_44, %c0_45] : memref<64x128xf32, #tpu.memory_space<vmem>>, vector<64x128xf32>
    tpu.vector_store %arg5[%c0_44, %c0_45], %45 {strides = array<i32>} : memref<64x128xf32, #tpu.memory_space<vmem>>, vector<64x128xf32>,
    %c0_46 = arith.constant 0 : index
    %c0_47 = arith.constant 0 : index
    %47 = tpu.strided_load %arg5[%c0_46, %c0_47] {strides = array<i32: 2, 1>} : memref<64x128xf32, #tpu.memory_space<vmem>>, vector<32x128xf32>
    %c1_48 = arith.constant 1 : index
    %c0_49 = arith.constant 0 : index
    %48 = tpu.strided_load %arg5[%c1_48, %c0_49] {strides = array<i32: 2, 1>} : memref<64x128xf32, #tpu.memory_space<vmem>>, vector<32x128xf32>
    %49 = arith.maximumf %47, %48 : vector<32x128xf32>
    %c0_50 = arith.constant 0 : index
    %c0_51 = arith.constant 0 : index
    %c0_52 = arith.constant 0 : index
    %50 = vector.load %arg4[%c0_50, %c0_51, %c0_52] : memref<1x32x128xf32, #tpu.memory_space<vmem>>, vector<1x32x128xf32>
    %51 = vector.shape_cast %50 : vector<1x32x128xf32> to vector<32x128xf32>
    %52 = vector.shape_cast %49 : vector<32x128xf32> to vector<1x32x128xf32>
    tpu.vector_store %arg4[%c0_50, %c0_51, %c0_52], %52 {strides = array<i32>} : memref<1x32x128xf32, #tpu.memory_space<vmem>>, vector<1x32x128xf32>,
    return
  }
  func.func @transform_0(%arg0: i32) -> (i32, i32, i32) {
    %c0_i32 = arith.constant 0 : i32
    %c0_i32_0 = arith.constant 0 : i32
    %c0_i32_1 = arith.constant 0 : i32
    return %arg0, %c0_i32, %c0_i32_0 : i32, i32, i32
  }
  func.func @transform_1(%arg0: i32) -> (i32, i32, i32) {
    %c0_i32 = arith.constant 0 : i32
    %c0_i32_0 = arith.constant 0 : i32
    %c0_i32_1 = arith.constant 0 : i32
    %c0_i32_2 = arith.constant 0 : i32
    return %c0_i32, %c0_i32_0, %c0_i32_1 : i32, i32, i32
  }
  func.func @transform_2(%arg0: i32) -> (i32, i32) {
    %c0_i32 = arith.constant 0 : i32
    %c0_i32_0 = arith.constant 0 : i32
    %c0_i32_1 = arith.constant 0 : i32
    return %c0_i32, %c0_i32_0 : i32, i32
  }
  func.func @transform_3(%arg0: i32) -> (i32, i32, i32) {
    %c0_i32 = arith.constant 0 : i32
    %c0_i32_0 = arith.constant 0 : i32
    %c0_i32_1 = arith.constant 0 : i32
    return %arg0, %c0_i32, %c0_i32_0 : i32, i32, i32
  }
}

module attributes {stable_mosaic.version = 11 : i64} {
  func.func @_conv_block_kernel(%arg0: i32, %arg1: memref<1x38x128xf32, #tpu.memory_space<vmem>>, %arg2: memref<7x128x128xf32, #tpu.memory_space<vmem>>, %arg3: memref<1x128xf32, #tpu.memory_space<vmem>>, %arg4: memref<1x8x128xf32, #tpu.memory_space<vmem>>, %arg5: memref<16x128xf32, #tpu.memory_space<vmem>>) attributes {dimension_semantics = [#tpu.dimension_semantics<parallel>], iteration_bounds = array<i64: 2>, scalar_prefetch = 0 : i64, scratch_operands = 1 : i64, tpu.core_type = #tpu.core_type<tc>, window_params = [{transform_indices = @transform_0, window_bounds = array<i64: 1, 38, 128>}, {pipeline_mode = #tpu.pipeline_mode<synchronous>, transform_indices = @transform_1, window_bounds = array<i64: 7, 128, 128>}, {pipeline_mode = #tpu.pipeline_mode<synchronous>, transform_indices = @transform_2, window_bounds = array<i64: 1, 128>}, {transform_indices = @transform_3, window_bounds = array<i64: 1, 8, 128>}]} {
    %c0 = arith.constant 0 : index
    %c0_0 = arith.constant 0 : index
    %c0_1 = arith.constant 0 : index
    %0 = tpu.strided_load %arg1[%c0, %c0_0, %c0_1] {strides = array<i32: 1, 2, 1>} : memref<1x38x128xf32, #tpu.memory_space<vmem>>, vector<1x16x128xf32>
    %1 = vector.shape_cast %0 : vector<1x16x128xf32> to vector<16x128xf32>
    %c0_2 = arith.constant 0 : index
    %c0_3 = arith.constant 0 : index
    %c0_4 = arith.constant 0 : index
    %2 = vector.load %arg2[%c0_2, %c0_3, %c0_4] : memref<7x128x128xf32, #tpu.memory_space<vmem>>, vector<1x128x128xf32>
    %3 = vector.shape_cast %2 : vector<1x128x128xf32> to vector<128x128xf32>
    %cst = arith.constant dense<0.000000e+00> : vector<16x128xf32>
    %4 = tpu.matmul %1, %3, %cst {dimension_numbers = #tpu.dot_dimension_numbers<[1], [0], [0], [1], [0, 0, 1, 1], [], []>} : vector<16x128xf32>, vector<128x128xf32>, vector<16x128xf32> -> vector<16x128xf32>
    %c0_5 = arith.constant 0 : index
    %c1 = arith.constant 1 : index
    %c0_6 = arith.constant 0 : index
    %5 = tpu.strided_load %arg1[%c0_5, %c1, %c0_6] {strides = array<i32: 1, 2, 1>} : memref<1x38x128xf32, #tpu.memory_space<vmem>>, vector<1x16x128xf32>
    %6 = vector.shape_cast %5 : vector<1x16x128xf32> to vector<16x128xf32>
    %c1_7 = arith.constant 1 : index
    %c0_8 = arith.constant 0 : index
    %c0_9 = arith.constant 0 : index
    %7 = vector.load %arg2[%c1_7, %c0_8, %c0_9] : memref<7x128x128xf32, #tpu.memory_space<vmem>>, vector<1x128x128xf32>
    %8 = vector.shape_cast %7 : vector<1x128x128xf32> to vector<128x128xf32>
    %cst_10 = arith.constant dense<0.000000e+00> : vector<16x128xf32>
    %9 = tpu.matmul %6, %8, %cst_10 {dimension_numbers = #tpu.dot_dimension_numbers<[1], [0], [0], [1], [0, 0, 1, 1], [], []>} : vector<16x128xf32>, vector<128x128xf32>, vector<16x128xf32> -> vector<16x128xf32>
    %10 = arith.addf %4, %9 : vector<16x128xf32>
    %c0_11 = arith.constant 0 : index
    %c2 = arith.constant 2 : index
    %c0_12 = arith.constant 0 : index
    %11 = tpu.strided_load %arg1[%c0_11, %c2, %c0_12] {strides = array<i32: 1, 2, 1>} : memref<1x38x128xf32, #tpu.memory_space<vmem>>, vector<1x16x128xf32>
    %12 = vector.shape_cast %11 : vector<1x16x128xf32> to vector<16x128xf32>
    %c2_13 = arith.constant 2 : index
    %c0_14 = arith.constant 0 : index
    %c0_15 = arith.constant 0 : index
    %13 = vector.load %arg2[%c2_13, %c0_14, %c0_15] : memref<7x128x128xf32, #tpu.memory_space<vmem>>, vector<1x128x128xf32>
    %14 = vector.shape_cast %13 : vector<1x128x128xf32> to vector<128x128xf32>
    %cst_16 = arith.constant dense<0.000000e+00> : vector<16x128xf32>
    %15 = tpu.matmul %12, %14, %cst_16 {dimension_numbers = #tpu.dot_dimension_numbers<[1], [0], [0], [1], [0, 0, 1, 1], [], []>} : vector<16x128xf32>, vector<128x128xf32>, vector<16x128xf32> -> vector<16x128xf32>
    %16 = arith.addf %10, %15 : vector<16x128xf32>
    %c0_17 = arith.constant 0 : index
    %c3 = arith.constant 3 : index
    %c0_18 = arith.constant 0 : index
    %17 = tpu.strided_load %arg1[%c0_17, %c3, %c0_18] {strides = array<i32: 1, 2, 1>} : memref<1x38x128xf32, #tpu.memory_space<vmem>>, vector<1x16x128xf32>
    %18 = vector.shape_cast %17 : vector<1x16x128xf32> to vector<16x128xf32>
    %c3_19 = arith.constant 3 : index
    %c0_20 = arith.constant 0 : index
    %c0_21 = arith.constant 0 : index
    %19 = vector.load %arg2[%c3_19, %c0_20, %c0_21] : memref<7x128x128xf32, #tpu.memory_space<vmem>>, vector<1x128x128xf32>
    %20 = vector.shape_cast %19 : vector<1x128x128xf32> to vector<128x128xf32>
    %cst_22 = arith.constant dense<0.000000e+00> : vector<16x128xf32>
    %21 = tpu.matmul %18, %20, %cst_22 {dimension_numbers = #tpu.dot_dimension_numbers<[1], [0], [0], [1], [0, 0, 1, 1], [], []>} : vector<16x128xf32>, vector<128x128xf32>, vector<16x128xf32> -> vector<16x128xf32>
    %22 = arith.addf %16, %21 : vector<16x128xf32>
    %c0_23 = arith.constant 0 : index
    %c4 = arith.constant 4 : index
    %c0_24 = arith.constant 0 : index
    %23 = tpu.strided_load %arg1[%c0_23, %c4, %c0_24] {strides = array<i32: 1, 2, 1>} : memref<1x38x128xf32, #tpu.memory_space<vmem>>, vector<1x16x128xf32>
    %24 = vector.shape_cast %23 : vector<1x16x128xf32> to vector<16x128xf32>
    %c4_25 = arith.constant 4 : index
    %c0_26 = arith.constant 0 : index
    %c0_27 = arith.constant 0 : index
    %25 = vector.load %arg2[%c4_25, %c0_26, %c0_27] : memref<7x128x128xf32, #tpu.memory_space<vmem>>, vector<1x128x128xf32>
    %26 = vector.shape_cast %25 : vector<1x128x128xf32> to vector<128x128xf32>
    %cst_28 = arith.constant dense<0.000000e+00> : vector<16x128xf32>
    %27 = tpu.matmul %24, %26, %cst_28 {dimension_numbers = #tpu.dot_dimension_numbers<[1], [0], [0], [1], [0, 0, 1, 1], [], []>} : vector<16x128xf32>, vector<128x128xf32>, vector<16x128xf32> -> vector<16x128xf32>
    %28 = arith.addf %22, %27 : vector<16x128xf32>
    %c0_29 = arith.constant 0 : index
    %c5 = arith.constant 5 : index
    %c0_30 = arith.constant 0 : index
    %29 = tpu.strided_load %arg1[%c0_29, %c5, %c0_30] {strides = array<i32: 1, 2, 1>} : memref<1x38x128xf32, #tpu.memory_space<vmem>>, vector<1x16x128xf32>
    %30 = vector.shape_cast %29 : vector<1x16x128xf32> to vector<16x128xf32>
    %c5_31 = arith.constant 5 : index
    %c0_32 = arith.constant 0 : index
    %c0_33 = arith.constant 0 : index
    %31 = vector.load %arg2[%c5_31, %c0_32, %c0_33] : memref<7x128x128xf32, #tpu.memory_space<vmem>>, vector<1x128x128xf32>
    %32 = vector.shape_cast %31 : vector<1x128x128xf32> to vector<128x128xf32>
    %cst_34 = arith.constant dense<0.000000e+00> : vector<16x128xf32>
    %33 = tpu.matmul %30, %32, %cst_34 {dimension_numbers = #tpu.dot_dimension_numbers<[1], [0], [0], [1], [0, 0, 1, 1], [], []>} : vector<16x128xf32>, vector<128x128xf32>, vector<16x128xf32> -> vector<16x128xf32>
    %34 = arith.addf %28, %33 : vector<16x128xf32>
    %c0_35 = arith.constant 0 : index
    %c6 = arith.constant 6 : index
    %c0_36 = arith.constant 0 : index
    %35 = tpu.strided_load %arg1[%c0_35, %c6, %c0_36] {strides = array<i32: 1, 2, 1>} : memref<1x38x128xf32, #tpu.memory_space<vmem>>, vector<1x16x128xf32>
    %36 = vector.shape_cast %35 : vector<1x16x128xf32> to vector<16x128xf32>
    %c6_37 = arith.constant 6 : index
    %c0_38 = arith.constant 0 : index
    %c0_39 = arith.constant 0 : index
    %37 = vector.load %arg2[%c6_37, %c0_38, %c0_39] : memref<7x128x128xf32, #tpu.memory_space<vmem>>, vector<1x128x128xf32>
    %38 = vector.shape_cast %37 : vector<1x128x128xf32> to vector<128x128xf32>
    %cst_40 = arith.constant dense<0.000000e+00> : vector<16x128xf32>
    %39 = tpu.matmul %36, %38, %cst_40 {dimension_numbers = #tpu.dot_dimension_numbers<[1], [0], [0], [1], [0, 0, 1, 1], [], []>} : vector<16x128xf32>, vector<128x128xf32>, vector<16x128xf32> -> vector<16x128xf32>
    %40 = arith.addf %34, %39 : vector<16x128xf32>
    %c0_41 = arith.constant 0 : index
    %c0_42 = arith.constant 0 : index
    %41 = vector.load %arg3[%c0_41, %c0_42] : memref<1x128xf32, #tpu.memory_space<vmem>>, vector<1x128xf32>
    %42 = vector.broadcast %41 : vector<1x128xf32> to vector<16x128xf32>
    %43 = arith.addf %40, %42 : vector<16x128xf32>
    %cst_43 = arith.constant 0.000000e+00 : f32
    %44 = vector.broadcast %cst_43 : f32 to vector<16x128xf32>
    %45 = arith.maximumf %43, %44 : vector<16x128xf32>
    %c0_44 = arith.constant 0 : index
    %c0_45 = arith.constant 0 : index
    %46 = vector.load %arg5[%c0_44, %c0_45] : memref<16x128xf32, #tpu.memory_space<vmem>>, vector<16x128xf32>
    tpu.vector_store %arg5[%c0_44, %c0_45], %45 {strides = array<i32>} : memref<16x128xf32, #tpu.memory_space<vmem>>, vector<16x128xf32>,
    %c0_46 = arith.constant 0 : index
    %c0_47 = arith.constant 0 : index
    %47 = tpu.strided_load %arg5[%c0_46, %c0_47] {strides = array<i32: 2, 1>} : memref<16x128xf32, #tpu.memory_space<vmem>>, vector<8x128xf32>
    %c1_48 = arith.constant 1 : index
    %c0_49 = arith.constant 0 : index
    %48 = tpu.strided_load %arg5[%c1_48, %c0_49] {strides = array<i32: 2, 1>} : memref<16x128xf32, #tpu.memory_space<vmem>>, vector<8x128xf32>
    %49 = arith.maximumf %47, %48 : vector<8x128xf32>
    %c0_50 = arith.constant 0 : index
    %c0_51 = arith.constant 0 : index
    %c0_52 = arith.constant 0 : index
    %50 = vector.load %arg4[%c0_50, %c0_51, %c0_52] : memref<1x8x128xf32, #tpu.memory_space<vmem>>, vector<1x8x128xf32>
    %51 = vector.shape_cast %50 : vector<1x8x128xf32> to vector<8x128xf32>
    %52 = vector.shape_cast %49 : vector<8x128xf32> to vector<1x8x128xf32>
    tpu.vector_store %arg4[%c0_50, %c0_51, %c0_52], %52 {strides = array<i32>} : memref<1x8x128xf32, #tpu.memory_space<vmem>>, vector<1x8x128xf32>,
    return
  }
  func.func @transform_0(%arg0: i32) -> (i32, i32, i32) {
    %c0_i32 = arith.constant 0 : i32
    %c0_i32_0 = arith.constant 0 : i32
    %c0_i32_1 = arith.constant 0 : i32
    return %arg0, %c0_i32, %c0_i32_0 : i32, i32, i32
  }
  func.func @transform_1(%arg0: i32) -> (i32, i32, i32) {
    %c0_i32 = arith.constant 0 : i32
    %c0_i32_0 = arith.constant 0 : i32
    %c0_i32_1 = arith.constant 0 : i32
    %c0_i32_2 = arith.constant 0 : i32
    return %c0_i32, %c0_i32_0, %c0_i32_1 : i32, i32, i32
  }
  func.func @transform_2(%arg0: i32) -> (i32, i32) {
    %c0_i32 = arith.constant 0 : i32
    %c0_i32_0 = arith.constant 0 : i32
    %c0_i32_1 = arith.constant 0 : i32
    return %c0_i32, %c0_i32_0 : i32, i32
  }
  func.func @transform_3(%arg0: i32) -> (i32, i32, i32) {
    %c0_i32 = arith.constant 0 : i32
    %c0_i32_0 = arith.constant 0 : i32
    %c0_i32_1 = arith.constant 0 : i32
    return %arg0, %c0_i32, %c0_i32_0 : i32, i32, i32
  }
}

module attributes {stable_mosaic.version = 11 : i64} {
  func.func @_conv_block_kernel(%arg0: i32, %arg1: memref<1x14x128xf32, #tpu.memory_space<vmem>>, %arg2: memref<7x128x128xf32, #tpu.memory_space<vmem>>, %arg3: memref<1x128xf32, #tpu.memory_space<vmem>>, %arg4: memref<1x2x128xf32, #tpu.memory_space<vmem>>, %arg5: memref<4x128xf32, #tpu.memory_space<vmem>>) attributes {dimension_semantics = [#tpu.dimension_semantics<parallel>], iteration_bounds = array<i64: 2>, scalar_prefetch = 0 : i64, scratch_operands = 1 : i64, tpu.core_type = #tpu.core_type<tc>, window_params = [{transform_indices = @transform_0, window_bounds = array<i64: 1, 14, 128>}, {pipeline_mode = #tpu.pipeline_mode<synchronous>, transform_indices = @transform_1, window_bounds = array<i64: 7, 128, 128>}, {pipeline_mode = #tpu.pipeline_mode<synchronous>, transform_indices = @transform_2, window_bounds = array<i64: 1, 128>}, {transform_indices = @transform_3, window_bounds = array<i64: 1, 2, 128>}]} {
    %c0 = arith.constant 0 : index
    %c0_0 = arith.constant 0 : index
    %c0_1 = arith.constant 0 : index
    %0 = tpu.strided_load %arg1[%c0, %c0_0, %c0_1] {strides = array<i32: 1, 2, 1>} : memref<1x14x128xf32, #tpu.memory_space<vmem>>, vector<1x4x128xf32>
    %1 = vector.shape_cast %0 : vector<1x4x128xf32> to vector<4x128xf32>
    %c0_2 = arith.constant 0 : index
    %c0_3 = arith.constant 0 : index
    %c0_4 = arith.constant 0 : index
    %2 = vector.load %arg2[%c0_2, %c0_3, %c0_4] : memref<7x128x128xf32, #tpu.memory_space<vmem>>, vector<1x128x128xf32>
    %3 = vector.shape_cast %2 : vector<1x128x128xf32> to vector<128x128xf32>
    %cst = arith.constant dense<0.000000e+00> : vector<4x128xf32>
    %4 = tpu.matmul %1, %3, %cst {dimension_numbers = #tpu.dot_dimension_numbers<[1], [0], [0], [1], [0, 0, 1, 1], [], []>} : vector<4x128xf32>, vector<128x128xf32>, vector<4x128xf32> -> vector<4x128xf32>
    %c0_5 = arith.constant 0 : index
    %c1 = arith.constant 1 : index
    %c0_6 = arith.constant 0 : index
    %5 = tpu.strided_load %arg1[%c0_5, %c1, %c0_6] {strides = array<i32: 1, 2, 1>} : memref<1x14x128xf32, #tpu.memory_space<vmem>>, vector<1x4x128xf32>
    %6 = vector.shape_cast %5 : vector<1x4x128xf32> to vector<4x128xf32>
    %c1_7 = arith.constant 1 : index
    %c0_8 = arith.constant 0 : index
    %c0_9 = arith.constant 0 : index
    %7 = vector.load %arg2[%c1_7, %c0_8, %c0_9] : memref<7x128x128xf32, #tpu.memory_space<vmem>>, vector<1x128x128xf32>
    %8 = vector.shape_cast %7 : vector<1x128x128xf32> to vector<128x128xf32>
    %cst_10 = arith.constant dense<0.000000e+00> : vector<4x128xf32>
    %9 = tpu.matmul %6, %8, %cst_10 {dimension_numbers = #tpu.dot_dimension_numbers<[1], [0], [0], [1], [0, 0, 1, 1], [], []>} : vector<4x128xf32>, vector<128x128xf32>, vector<4x128xf32> -> vector<4x128xf32>
    %10 = arith.addf %4, %9 : vector<4x128xf32>
    %c0_11 = arith.constant 0 : index
    %c2 = arith.constant 2 : index
    %c0_12 = arith.constant 0 : index
    %11 = tpu.strided_load %arg1[%c0_11, %c2, %c0_12] {strides = array<i32: 1, 2, 1>} : memref<1x14x128xf32, #tpu.memory_space<vmem>>, vector<1x4x128xf32>
    %12 = vector.shape_cast %11 : vector<1x4x128xf32> to vector<4x128xf32>
    %c2_13 = arith.constant 2 : index
    %c0_14 = arith.constant 0 : index
    %c0_15 = arith.constant 0 : index
    %13 = vector.load %arg2[%c2_13, %c0_14, %c0_15] : memref<7x128x128xf32, #tpu.memory_space<vmem>>, vector<1x128x128xf32>
    %14 = vector.shape_cast %13 : vector<1x128x128xf32> to vector<128x128xf32>
    %cst_16 = arith.constant dense<0.000000e+00> : vector<4x128xf32>
    %15 = tpu.matmul %12, %14, %cst_16 {dimension_numbers = #tpu.dot_dimension_numbers<[1], [0], [0], [1], [0, 0, 1, 1], [], []>} : vector<4x128xf32>, vector<128x128xf32>, vector<4x128xf32> -> vector<4x128xf32>
    %16 = arith.addf %10, %15 : vector<4x128xf32>
    %c0_17 = arith.constant 0 : index
    %c3 = arith.constant 3 : index
    %c0_18 = arith.constant 0 : index
    %17 = tpu.strided_load %arg1[%c0_17, %c3, %c0_18] {strides = array<i32: 1, 2, 1>} : memref<1x14x128xf32, #tpu.memory_space<vmem>>, vector<1x4x128xf32>
    %18 = vector.shape_cast %17 : vector<1x4x128xf32> to vector<4x128xf32>
    %c3_19 = arith.constant 3 : index
    %c0_20 = arith.constant 0 : index
    %c0_21 = arith.constant 0 : index
    %19 = vector.load %arg2[%c3_19, %c0_20, %c0_21] : memref<7x128x128xf32, #tpu.memory_space<vmem>>, vector<1x128x128xf32>
    %20 = vector.shape_cast %19 : vector<1x128x128xf32> to vector<128x128xf32>
    %cst_22 = arith.constant dense<0.000000e+00> : vector<4x128xf32>
    %21 = tpu.matmul %18, %20, %cst_22 {dimension_numbers = #tpu.dot_dimension_numbers<[1], [0], [0], [1], [0, 0, 1, 1], [], []>} : vector<4x128xf32>, vector<128x128xf32>, vector<4x128xf32> -> vector<4x128xf32>
    %22 = arith.addf %16, %21 : vector<4x128xf32>
    %c0_23 = arith.constant 0 : index
    %c4 = arith.constant 4 : index
    %c0_24 = arith.constant 0 : index
    %23 = tpu.strided_load %arg1[%c0_23, %c4, %c0_24] {strides = array<i32: 1, 2, 1>} : memref<1x14x128xf32, #tpu.memory_space<vmem>>, vector<1x4x128xf32>
    %24 = vector.shape_cast %23 : vector<1x4x128xf32> to vector<4x128xf32>
    %c4_25 = arith.constant 4 : index
    %c0_26 = arith.constant 0 : index
    %c0_27 = arith.constant 0 : index
    %25 = vector.load %arg2[%c4_25, %c0_26, %c0_27] : memref<7x128x128xf32, #tpu.memory_space<vmem>>, vector<1x128x128xf32>
    %26 = vector.shape_cast %25 : vector<1x128x128xf32> to vector<128x128xf32>
    %cst_28 = arith.constant dense<0.000000e+00> : vector<4x128xf32>
    %27 = tpu.matmul %24, %26, %cst_28 {dimension_numbers = #tpu.dot_dimension_numbers<[1], [0], [0], [1], [0, 0, 1, 1], [], []>} : vector<4x128xf32>, vector<128x128xf32>, vector<4x128xf32> -> vector<4x128xf32>
    %28 = arith.addf %22, %27 : vector<4x128xf32>
    %c0_29 = arith.constant 0 : index
    %c5 = arith.constant 5 : index
    %c0_30 = arith.constant 0 : index
    %29 = tpu.strided_load %arg1[%c0_29, %c5, %c0_30] {strides = array<i32: 1, 2, 1>} : memref<1x14x128xf32, #tpu.memory_space<vmem>>, vector<1x4x128xf32>
    %30 = vector.shape_cast %29 : vector<1x4x128xf32> to vector<4x128xf32>
    %c5_31 = arith.constant 5 : index
    %c0_32 = arith.constant 0 : index
    %c0_33 = arith.constant 0 : index
    %31 = vector.load %arg2[%c5_31, %c0_32, %c0_33] : memref<7x128x128xf32, #tpu.memory_space<vmem>>, vector<1x128x128xf32>
    %32 = vector.shape_cast %31 : vector<1x128x128xf32> to vector<128x128xf32>
    %cst_34 = arith.constant dense<0.000000e+00> : vector<4x128xf32>
    %33 = tpu.matmul %30, %32, %cst_34 {dimension_numbers = #tpu.dot_dimension_numbers<[1], [0], [0], [1], [0, 0, 1, 1], [], []>} : vector<4x128xf32>, vector<128x128xf32>, vector<4x128xf32> -> vector<4x128xf32>
    %34 = arith.addf %28, %33 : vector<4x128xf32>
    %c0_35 = arith.constant 0 : index
    %c6 = arith.constant 6 : index
    %c0_36 = arith.constant 0 : index
    %35 = tpu.strided_load %arg1[%c0_35, %c6, %c0_36] {strides = array<i32: 1, 2, 1>} : memref<1x14x128xf32, #tpu.memory_space<vmem>>, vector<1x4x128xf32>
    %36 = vector.shape_cast %35 : vector<1x4x128xf32> to vector<4x128xf32>
    %c6_37 = arith.constant 6 : index
    %c0_38 = arith.constant 0 : index
    %c0_39 = arith.constant 0 : index
    %37 = vector.load %arg2[%c6_37, %c0_38, %c0_39] : memref<7x128x128xf32, #tpu.memory_space<vmem>>, vector<1x128x128xf32>
    %38 = vector.shape_cast %37 : vector<1x128x128xf32> to vector<128x128xf32>
    %cst_40 = arith.constant dense<0.000000e+00> : vector<4x128xf32>
    %39 = tpu.matmul %36, %38, %cst_40 {dimension_numbers = #tpu.dot_dimension_numbers<[1], [0], [0], [1], [0, 0, 1, 1], [], []>} : vector<4x128xf32>, vector<128x128xf32>, vector<4x128xf32> -> vector<4x128xf32>
    %40 = arith.addf %34, %39 : vector<4x128xf32>
    %c0_41 = arith.constant 0 : index
    %c0_42 = arith.constant 0 : index
    %41 = vector.load %arg3[%c0_41, %c0_42] : memref<1x128xf32, #tpu.memory_space<vmem>>, vector<1x128xf32>
    %42 = vector.broadcast %41 : vector<1x128xf32> to vector<4x128xf32>
    %43 = arith.addf %40, %42 : vector<4x128xf32>
    %cst_43 = arith.constant 0.000000e+00 : f32
    %44 = vector.broadcast %cst_43 : f32 to vector<4x128xf32>
    %45 = arith.maximumf %43, %44 : vector<4x128xf32>
    %c0_44 = arith.constant 0 : index
    %c0_45 = arith.constant 0 : index
    %46 = vector.load %arg5[%c0_44, %c0_45] : memref<4x128xf32, #tpu.memory_space<vmem>>, vector<4x128xf32>
    tpu.vector_store %arg5[%c0_44, %c0_45], %45 {strides = array<i32>} : memref<4x128xf32, #tpu.memory_space<vmem>>, vector<4x128xf32>,
    %c0_46 = arith.constant 0 : index
    %c0_47 = arith.constant 0 : index
    %47 = tpu.strided_load %arg5[%c0_46, %c0_47] {strides = array<i32: 2, 1>} : memref<4x128xf32, #tpu.memory_space<vmem>>, vector<2x128xf32>
    %c1_48 = arith.constant 1 : index
    %c0_49 = arith.constant 0 : index
    %48 = tpu.strided_load %arg5[%c1_48, %c0_49] {strides = array<i32: 2, 1>} : memref<4x128xf32, #tpu.memory_space<vmem>>, vector<2x128xf32>
    %49 = arith.maximumf %47, %48 : vector<2x128xf32>
    %c0_50 = arith.constant 0 : index
    %c0_51 = arith.constant 0 : index
    %c0_52 = arith.constant 0 : index
    %50 = vector.load %arg4[%c0_50, %c0_51, %c0_52] : memref<1x2x128xf32, #tpu.memory_space<vmem>>, vector<1x2x128xf32>
    %51 = vector.shape_cast %50 : vector<1x2x128xf32> to vector<2x128xf32>
    %52 = vector.shape_cast %49 : vector<2x128xf32> to vector<1x2x128xf32>
    tpu.vector_store %arg4[%c0_50, %c0_51, %c0_52], %52 {strides = array<i32>} : memref<1x2x128xf32, #tpu.memory_space<vmem>>, vector<1x2x128xf32>,
    return
  }
  func.func @transform_0(%arg0: i32) -> (i32, i32, i32) {
    %c0_i32 = arith.constant 0 : i32
    %c0_i32_0 = arith.constant 0 : i32
    %c0_i32_1 = arith.constant 0 : i32
    return %arg0, %c0_i32, %c0_i32_0 : i32, i32, i32
  }
  func.func @transform_1(%arg0: i32) -> (i32, i32, i32) {
    %c0_i32 = arith.constant 0 : i32
    %c0_i32_0 = arith.constant 0 : i32
    %c0_i32_1 = arith.constant 0 : i32
    %c0_i32_2 = arith.constant 0 : i32
    return %c0_i32, %c0_i32_0, %c0_i32_1 : i32, i32, i32
  }
  func.func @transform_2(%arg0: i32) -> (i32, i32) {
    %c0_i32 = arith.constant 0 : i32
    %c0_i32_0 = arith.constant 0 : i32
    %c0_i32_1 = arith.constant 0 : i32
    return %c0_i32, %c0_i32_0 : i32, i32
  }
  func.func @transform_3(%arg0: i32) -> (i32, i32, i32) {
    %c0_i32 = arith.constant 0 : i32
    %c0_i32_0 = arith.constant 0 : i32
    %c0_i32_1 = arith.constant 0 : i32
    return %arg0, %c0_i32, %c0_i32_0 : i32, i32, i32
  }
}

module attributes {stable_mosaic.version = 11 : i64} {
  func.func @_fc_kernel(%arg0: i32, %arg1: memref<2x256xf32, #tpu.memory_space<vmem>>, %arg2: memref<256x128xf32, #tpu.memory_space<vmem>>, %arg3: memref<1x128xf32, #tpu.memory_space<vmem>>, %arg4: memref<2x128xf32, #tpu.memory_space<vmem>>) attributes {dimension_semantics = [#tpu.dimension_semantics<arbitrary>], iteration_bounds = array<i64: 1>, scalar_prefetch = 0 : i64, scratch_operands = 0 : i64, tpu.core_type = #tpu.core_type<tc>, window_params = [{pipeline_mode = #tpu.pipeline_mode<synchronous>, transform_indices = @transform_0, window_bounds = array<i64: 2, 256>}, {pipeline_mode = #tpu.pipeline_mode<synchronous>, transform_indices = @transform_1, window_bounds = array<i64: 256, 128>}, {pipeline_mode = #tpu.pipeline_mode<synchronous>, transform_indices = @transform_2, window_bounds = array<i64: 1, 128>}, {pipeline_mode = #tpu.pipeline_mode<synchronous>, transform_indices = @transform_3, window_bounds = array<i64: 2, 128>}]} {
    %c0 = arith.constant 0 : index
    %c0_0 = arith.constant 0 : index
    %0 = vector.load %arg1[%c0, %c0_0] : memref<2x256xf32, #tpu.memory_space<vmem>>, vector<2x256xf32>
    %c0_1 = arith.constant 0 : index
    %c0_2 = arith.constant 0 : index
    %1 = vector.load %arg2[%c0_1, %c0_2] : memref<256x128xf32, #tpu.memory_space<vmem>>, vector<256x128xf32>
    %cst = arith.constant dense<0.000000e+00> : vector<2x128xf32>
    %2 = tpu.matmul %0, %1, %cst {dimension_numbers = #tpu.dot_dimension_numbers<[1], [0], [0], [1], [0, 0, 1, 1], [], []>} : vector<2x256xf32>, vector<256x128xf32>, vector<2x128xf32> -> vector<2x128xf32>
    %c0_3 = arith.constant 0 : index
    %c0_4 = arith.constant 0 : index
    %3 = vector.load %arg3[%c0_3, %c0_4] : memref<1x128xf32, #tpu.memory_space<vmem>>, vector<1x128xf32>
    %4 = vector.broadcast %3 : vector<1x128xf32> to vector<2x128xf32>
    %5 = arith.addf %2, %4 : vector<2x128xf32>
    %c0_5 = arith.constant 0 : index
    %c0_6 = arith.constant 0 : index
    %6 = vector.load %arg4[%c0_5, %c0_6] : memref<2x128xf32, #tpu.memory_space<vmem>>, vector<2x128xf32>
    tpu.vector_store %arg4[%c0_5, %c0_6], %5 {strides = array<i32>} : memref<2x128xf32, #tpu.memory_space<vmem>>, vector<2x128xf32>,
    return
  }
  func.func @transform_0(%arg0: i32) -> (i32, i32) {
    %c0_i32 = arith.constant 0 : i32
    %c0_i32_0 = arith.constant 0 : i32
    %c0_i32_1 = arith.constant 0 : i32
    return %c0_i32, %c0_i32_0 : i32, i32
  }
  func.func @transform_1(%arg0: i32) -> (i32, i32) {
    %c0_i32 = arith.constant 0 : i32
    %c0_i32_0 = arith.constant 0 : i32
    %c0_i32_1 = arith.constant 0 : i32
    return %c0_i32, %c0_i32_0 : i32, i32
  }
  func.func @transform_2(%arg0: i32) -> (i32, i32) {
    %c0_i32 = arith.constant 0 : i32
    %c0_i32_0 = arith.constant 0 : i32
    %c0_i32_1 = arith.constant 0 : i32
    return %c0_i32, %c0_i32_0 : i32, i32
  }
  func.func @transform_3(%arg0: i32) -> (i32, i32) {
    %c0_i32 = arith.constant 0 : i32
    %c0_i32_0 = arith.constant 0 : i32
    %c0_i32_1 = arith.constant 0 : i32
    return %c0_i32, %c0_i32_0 : i32, i32
  }
}

</mosaic_0001>

<bundles_post_ra>
// kernel: _lambda_.4
= control target key start
LH: loop header
LB: loop body
LE: loop exit
PB: predicated region body
PF: predicated region fallthrough
CT: control target
= control target key end

     0   :  { %8 = vsyncpa [#allocation4], 0  ;;  %s2229_s12 = smov 0   ;;  %s2350_s0 = inlined_call_operand.vmem [shape: f32[2,134,128], index: 0, kind: input, shape index: {}]   ;;  %s2351_s1 = inlined_call_operand.hbm [shape: f32[7,128,128], index: 1, kind: input, shape index: {}]   ;;  %s2352_s2 = inlined_call_operand.vmem [shape: f32[1,128], index: 2, kind: input, shape index: {}]   ;;  %s2353_s3 = inlined_call_operand.vmem [shape: f32[2,32,128], index: 3, kind: output, shape index: {}]  }
   0x1 LB: > { %s2235_s13 = sadd.s32 4294967295, %s2204_s12   ;;  %p1313_p0 = scmp.ge.s32.totalorder %s2204_s12, 1  ;;  %s2204_s12 = sphi %s2229_s12, %s14_s12  }
   0x2   : > { %p113_p1 = scmp.lt.s32.totalorder %s2204_s12, 3  ;;  %s2206_s14 = smov [#allocation3]  }
   0x3   : > { %s125_s15 = sshll.u32 %s2206_s14, 4  ;;  %p2354_p3 = scmp.eq.s32.totalorder %s2235_s13, 0  ;;  %s126_s15 = int_to_ptr.vmem [resolvable:$true] %s125_s15 }
   0x4   : > { %p2239_p2 = pnand %p1313_p0, %p113_p1  ;;  %s2166_s20 = scalar_lea.hbm %s2351_s1, 14336 }
   0x5   : > { %p2167_p6 = scmp.ne.s32.totalorder %s2351_s1, %s2166_s20  ;;  %p2173_p10 = scmp.lt.u32.totalorder %s2166_s20, %s2351_s1 }
   0x6   : > { %s2356_s16 = scalar_select %p2239_p2, 1, 0 }
   0x7   : > { %p2149_p4 = pneg %p2239_p2 }
   0x9   : > { %p2248_p5 = pnand %p2354_p3, %p2149_p4 }
   0xb   : > { %p2168_p7 = pneg %p2248_p5 }
   0xd   : > { %p2169_p8 = pnand %p2168_p7, %p2167_p6 }
   0xf   : > { %p2170_p9 = pneg %p2169_p8 }
  0x11   : > { %p2175_p11 = pnand %p2173_p10, %p2170_p9 }
  0x13   : > { %2178 = shalt.err (!%p2175_p11)
}
  0x14   : > { %s2179_s25 = scalar_lea.vmem %s126_s15, 14336  ;;  %p2187_p1 = scmp.lt.s32.totalorder %s126_s15, %s126_s15 }
  0x15   : > { %p2180_p12 = scmp.ne.s32.totalorder %s126_s15, %s2179_s25  ;;  %p2188_p4 = scmp.lt.s32.totalorder %s2179_s25, %s2179_s25 }
  0x17   : > { %p2182_p13 = pnand %p2180_p12, %p2168_p7  ;;  %p2189_p3 = por %p2188_p4, %p2187_p1 }
  0x19   : > { %p2183_p0 = pneg %p2182_p13 }
  0x1b   : > { %p2190_p2 = pnand %p2189_p3, %p2183_p0 }
  0x1d   : > { %2193 = shalt.err (!%p2190_p2)
}
  0x1e   : > { %s2207_s26 = smov 128   ;;  %s2208_s27 = smov 8  }
  0x1f   : > { %2152 = dma.hbm_to_vmem [thread:$0]  (!%p2248_p5), %s2351_s1, 14336, %s126_s15, [#allocation4], %s2207_s26, %s2207_s26, %s2208_s27  }
  0x20   : > { %p2358_p6 = scmp.ne.s32.totalorder %s2356_s16, 0 }
  0x21   : > { %p2359_p8 = scmp.eq.s32.totalorder (!%p2358_p6), %s2235_s13, 0 }
  0x22   : > { %152 = sbr.rel (%p2358_p6) target bundleno = 408 (0x198), region = 32 }
  0x29   : > { %2199 = dma.done.wait (%p2359_p8), [#allocation4], 14336   ;;  %p2360_p7 = pmov %p2359_p8 }
  0x2a   : > { %p176_p2 = scmp.lt.s32.totalorder %s2235_s13, 1  ;;  %v234_v0 = vld [vmem:[#allocation3 + $0x80] sm:$0xff]  ;;  %v235_v1 = vld [vmem:[#allocation3 + $0x88] sm:$0xff]  ;;  %v236_v5 = vld [vmem:[#allocation3 + $0x90] sm:$0xff] }
  0x2b   : > { %2201 = vsyncadd (%p2360_p7), [#allocation4], 4294952960  ;;  %v623_v2 = vld [vmem:[#allocation3 + $0x180] sm:$0xff]  ;;  %v1856_v3 = vpack.c.bf16 %v235_v1, %v234_v0  ;;  %v624_v4 = vld [vmem:[#allocation3 + $0x188] sm:$0xff] }
  0x2c   : > { %s2362_s13 = smov (!%p176_p2, %s2235_s13), 1  ;;  %v237_v6 = vld [vmem:[#allocation3 + $0x98] sm:$0xff]  ;;  %v1952_v7 = vpack.c.bf16 %v624_v4, %v623_v2  ;;  %v625_v9 = vld [vmem:[#allocation3 + $0x190] sm:$0xff]  ;;  %v238_v11 = vld [vmem:[#allocation3 + $0xa0] sm:$0xff] }
  0x2d   : > { %v1860_v8 = vpack.c.bf16 %v237_v6, %v236_v5  ;;  %v626_v10 = vld [vmem:[#allocation3 + $0x198] sm:$0xff]  ;;  %1857 = vmatprep.subr.bf16.mxu1 %v1856_v3  ;;  %v239_v13 = vld [vmem:[#allocation3 + $0xa8] sm:$0xff]  ;;  %v627_v14 = vld [vmem:[#allocation3 + $0x1a0] sm:$0xff]  ;;  %s2144_s30 = smul.u32 136, %s2362_s13  ;;  %s1379_s9 = sshll.u32 %s2362_s13, 5 }
  0x2e   : > { %v1956_v12 = vpack.c.bf16 %v626_v10, %v625_v9  ;;  %v628_v15 = vld [vmem:[#allocation3 + $0x1a8] sm:$0xff]  ;;  %1953 = vmatprep.subr.bf16.mxu0 %v1952_v7  ;;  %1859 = vmatpush3.bf16.msra.mxu1 %v1856_v3  ;;  %v1864_v16 = vpack.c.bf16 %v239_v13, %v238_v11  ;;  %v240_v18 = vld [vmem:[#allocation3 + $0xb0] sm:$0xff]  ;;  %v241_v19 = vld [vmem:[#allocation3 + $0xb8] sm:$0xff]  ;;  %s185_s14 = scalar_lea.vmem %s2353_s3, %s1379_s9 }
  0x2f   : > { %1955 = vmatpush3.bf16.msra.mxu0 %v1952_v7  ;;  %1861 = vmatprep.subr.bf16.mxu1 %v1860_v8  ;;  %v1960_v17 = vpack.c.bf16 %v628_v15, %v627_v14  ;;  %v629_v20 = vld [vmem:[#allocation3 + $0x1b0] sm:$0xff]  ;;  %v630_v21 = vld [vmem:[#allocation3 + $0x1b8] sm:$0xff]  ;;  %s2282_s6 = scalar_lea.vmem %s2350_s0, %s2144_s30  ;;  %v1868_v22 = vpack.c.bf16 %v241_v19, %v240_v18  ;;  %v242_v24 = vld [vmem:[#allocation3 + $0xc0] sm:$0xff] }
  0x30   : > { %1957 = vmatprep.subr.bf16.mxu0 %v1956_v12  ;;  %v1964_v23 = vpack.c.bf16 %v630_v21, %v629_v20  ;;  %v243_v25 = vld [vmem:[#allocation3 + $0xc8] sm:$0xff]  ;;  %v631_v27 = vld [vmem:[#allocation3 + $0x1c0] sm:$0xff]  ;;  %v244_v32 = vld [vmem:[#allocation3 + $0xd0] sm:$0xff] }
  0x31   : > { %v1328_v26 = vld [vmem:[%s2282_s6 + $0x1] ss:$2 sm:$0xff]  ;;  %v1872_v30 = vpack.c.bf16 %v243_v25, %v242_v24  ;;  %v245_v33 = vld [vmem:[#allocation3 + $0xd8] sm:$0xff]  ;;  %v633_v34 = vld [vmem:[#allocation3 + $0x1d0] sm:$0xff] }
  0x32   : > { %1863 = vmatpush3.bf16.msra.mxu1 %v1860_v8  ;;  %v632_v28 = vld [vmem:[#allocation3 + $0x1c8] sm:$0xff]  ;;  %1580 = vmatprep.mubr.f32.mxu1 %v1328_v26  ;;  %v634_v35 = vld [vmem:[#allocation3 + $0x1d8] sm:$0xff]  ;;  %v1876_v36 = vpack.c.bf16 %v245_v33, %v244_v32  ;;  %v246_v38 = vld [vmem:[#allocation3 + $0xe0] sm:$0xff] }
  0x33   : > { %1959 = vmatpush3.bf16.msra.mxu0 %v1956_v12  ;;  %1865 = vmatprep.subr.bf16.mxu1 %v1864_v16  ;;  %v1344_v29 = vld [vmem:[%s2282_s6 + $0x3] ss:$2 sm:$0xff]  ;;  %v1968_v31 = vpack.c.bf16 %v632_v28, %v631_v27  ;;  %v1972_v37 = vpack.c.bf16 %v634_v35, %v633_v34  ;;  %v249_v45 = vld [vmem:[#allocation3 + $0xf8] sm:$0xff]  ;;  %v186_v34 = vld [vmem:[%s2282_s6] ss:$2 sm:$0xff] }
  0x34   : > { %1961 = vmatprep.subr.bf16.mxu0 %v1960_v17  ;;  %1712 = vmatprep.mubr.f32.mxu0 %v1344_v29  ;;  %v247_v39 = vld [vmem:[#allocation3 + $0xe8] sm:$0xff]  ;;  %v635_v40 = vld [vmem:[#allocation3 + $0x1e0] sm:$0xff]  ;;  %v248_v44 = vld [vmem:[#allocation3 + $0xf0] sm:$0xff] }
  0x35   : > { %v636_v41 = vld [vmem:[#allocation3 + $0x1e8] sm:$0xff]  ;;  %v1880_v42 = vpack.c.bf16 %v247_v39, %v246_v38  ;;  %v637_v46 = vld [vmem:[#allocation3 + $0x1f0] sm:$0xff]  ;;  %v638_v47 = vld [vmem:[#allocation3 + $0x1f8] sm:$0xff]  ;;  %v1884_v48 = vpack.c.bf16 %v249_v45, %v248_v44 }
  0x36   : > { %1867 = vmatpush3.bf16.msra.mxu1 %v1864_v16  ;;  %v1976_v43 = vpack.c.bf16 %v636_v41, %v635_v40  ;;  %v1980_v49 = vpack.c.bf16 %v638_v47, %v637_v46  ;;  %v201_v50 = vld [vmem:[#allocation3] sm:$0xff]  ;;  %v202_v51 = vld [vmem:[#allocation3 + $0x8] sm:$0xff]  ;;  %v203_v56 = vld [vmem:[#allocation3 + $0x10] sm:$0xff] }
  0x37   : > { %1963 = vmatpush3.bf16.msra.mxu0 %v1960_v17  ;;  %1869 = vmatprep.subr.bf16.mxu1 %v1868_v22  ;;  %v769_v52 = vld [vmem:[#allocation3 + $0x200] sm:$0xff]  ;;  %v770_v53 = vld [vmem:[#allocation3 + $0x208] sm:$0xff]  ;;  %v1888_v54 = vpack.c.bf16 %v202_v51, %v201_v50  ;;  %v204_v57 = vld [vmem:[#allocation3 + $0x18] sm:$0xff] }
  0x38   : > { %1965 = vmatprep.subr.bf16.mxu0 %v1964_v23  ;;  %v1984_v55 = vpack.c.bf16 %v770_v53, %v769_v52  ;;  %v771_v58 = vld [vmem:[#allocation3 + $0x210] sm:$0xff]  ;;  %v772_v59 = vld [vmem:[#allocation3 + $0x218] sm:$0xff]  ;;  %v1892_v62 = vpack.c.bf16 %v204_v57, %v203_v56  ;;  %v205_v0 = vld [vmem:[#allocation3 + $0x20] sm:$0xff] }
  0x39   : > { %v1329_v60 = vld [vmem:[%s2282_s6 + $0x11] ss:$2 sm:$0xff]  ;;  %v1988_v63 = vpack.c.bf16 %v772_v59, %v771_v58  ;;  %v206_v1 = vld [vmem:[#allocation3 + $0x28] sm:$0xff]  ;;  %v773_v2 = vld [vmem:[#allocation3 + $0x220] sm:$0xff] }
  0x3a   : > { %1871 = vmatpush3.bf16.msra.mxu1 %v1868_v22  ;;  %v1345_v61 = vld [vmem:[%s2282_s6 + $0x13] ss:$2 sm:$0xff]  ;;  %v774_v3 = vld [vmem:[#allocation3 + $0x228] sm:$0xff]  ;;  %v1896_v7 = vpack.c.bf16 %v206_v1, %v205_v0 }
  0x3b   : > { %1967 = vmatpush3.bf16.msra.mxu0 %v1964_v23  ;;  %1873 = vmatprep.subr.bf16.mxu1 %v1872_v30  ;;  %v1330_v4 = vld [vmem:[%s2282_s6 + $0x21] ss:$2 sm:$0xff]  ;;  %v1331_v6 = vld [vmem:[%s2282_s6 + $0x31] ss:$2 sm:$0xff]  ;;  %v1992_v9 = vpack.c.bf16 %v774_v3, %v773_v2  ;;  %v1352_v35 = vld [vmem:[%s2282_s6 + $0x4] ss:$2 sm:$0xff] }
  0x3c   : > { %1969 = vmatprep.subr.bf16.mxu0 %v1968_v31  ;;  %v1346_v5 = vld [vmem:[%s2282_s6 + $0x23] ss:$2 sm:$0xff]  ;;  %v1347_v8 = vld [vmem:[%s2282_s6 + $0x33] ss:$2 sm:$0xff] }
  0x3d   : > { %v207_v10 = vld [vmem:[#allocation3 + $0x30] sm:$0xff]  ;;  %v208_v11 = vld [vmem:[#allocation3 + $0x38] sm:$0xff]  ;;  %v1332_v14 = vld [vmem:[%s2282_s6 + $0x41] ss:$2 sm:$0xff] }
  0x3e   : > { %1875 = vmatpush3.bf16.msra.mxu1 %v1872_v30  ;;  %v775_v12 = vld [vmem:[#allocation3 + $0x230] sm:$0xff]  ;;  %v776_v13 = vld [vmem:[#allocation3 + $0x238] sm:$0xff]  ;;  %v1900_v17 = vpack.c.bf16 %v208_v11, %v207_v10  ;;  %v209_v20 = vld [vmem:[#allocation3 + $0x40] sm:$0xff] }
  0x3f   : > { %1971 = vmatpush3.bf16.msra.mxu0 %v1968_v31  ;;  %1877 = vmatprep.subr.bf16.mxu1 %v1876_v36  ;;  %v1348_v15 = vld [vmem:[%s2282_s6 + $0x43] ss:$2 sm:$0xff]  ;;  %v1349_v18 = vld [vmem:[%s2282_s6 + $0x53] ss:$2 sm:$0xff]  ;;  %v1996_v19 = vpack.c.bf16 %v776_v13, %v775_v12 }
  0x40   : > { %1973 = vmatprep.subr.bf16.mxu0 %v1972_v37  ;;  %v1333_v16 = vld [vmem:[%s2282_s6 + $0x51] ss:$2 sm:$0xff]  ;;  %v210_v21 = vld [vmem:[#allocation3 + $0x48] sm:$0xff]  ;;  %v777_v22 = vld [vmem:[#allocation3 + $0x240] sm:$0xff] }
  0x41   : > { %v778_v23 = vld [vmem:[#allocation3 + $0x248] sm:$0xff]  ;;  %v1335_v26 = vld [vmem:[%s2282_s6 + $0x71] ss:$2 sm:$0xff]  ;;  %v1904_v27 = vpack.c.bf16 %v210_v21, %v209_v20  ;;  %v213_v38 = vld [vmem:[#allocation3 + $0x60] sm:$0xff] }
  0x42   : > { %1879 = vmatpush3.bf16.msra.mxu1 %v1876_v36  ;;  %v1334_v24 = vld [vmem:[%s2282_s6 + $0x61] ss:$2 sm:$0xff]  ;;  %v2000_v29 = vpack.c.bf16 %v778_v23, %v777_v22  ;;  %v211_v30 = vld [vmem:[#allocation3 + $0x50] sm:$0xff]  ;;  %v212_v31 = vld [vmem:[#allocation3 + $0x58] sm:$0xff] }
  0x43   : > { %1975 = vmatpush3.bf16.msra.mxu0 %v1972_v37  ;;  %1881 = vmatprep.subr.bf16.mxu1 %v1880_v42  ;;  %v1350_v25 = vld [vmem:[%s2282_s6 + $0x63] ss:$2 sm:$0xff]  ;;  %v1351_v28 = vld [vmem:[%s2282_s6 + $0x73] ss:$2 sm:$0xff]  ;;  %v1908_v36 = vpack.c.bf16 %v212_v31, %v211_v30 }
  0x44   : > { %1977 = vmatprep.subr.bf16.mxu0 %v1976_v43  ;;  %v779_v32 = vld [vmem:[#allocation3 + $0x250] sm:$0xff]  ;;  %v780_v33 = vld [vmem:[#allocation3 + $0x258] sm:$0xff]  ;;  %v214_v39 = vld [vmem:[#allocation3 + $0x68] sm:$0xff] }
  0x45   : > { %v2004_v37 = vpack.c.bf16 %v780_v33, %v779_v32  ;;  %v781_v40 = vld [vmem:[#allocation3 + $0x260] sm:$0xff]  ;;  %v782_v41 = vld [vmem:[#allocation3 + $0x268] sm:$0xff]  ;;  %v215_v44 = vld [vmem:[#allocation3 + $0x70] sm:$0xff] }
  0x46   : > { %1883 = vmatpush3.bf16.msra.mxu1 %v1880_v42  ;;  %v1912_v42 = vpack.c.bf16 %v214_v39, %v213_v38  ;;  %v216_v45 = vld [vmem:[#allocation3 + $0x78] sm:$0xff]  ;;  %v783_v46 = vld [vmem:[#allocation3 + $0x270] sm:$0xff]  ;;  %v477_v50 = vld [vmem:[#allocation3 + $0x100] sm:$0xff] }
  0x47   : > { %1979 = vmatpush3.bf16.msra.mxu0 %v1976_v43  ;;  %1885 = vmatprep.subr.bf16.mxu1 %v1884_v48  ;;  %v2008_v43 = vpack.c.bf16 %v782_v41, %v781_v40  ;;  %v784_v47 = vld [vmem:[#allocation3 + $0x278] sm:$0xff]  ;;  %v478_v51 = vld [vmem:[#allocation3 + $0x108] sm:$0xff]  ;;  %v915_v52 = vld [vmem:[#allocation3 + $0x280] sm:$0xff] }
  0x48   : > { %1981 = vmatprep.subr.bf16.mxu0 %v1980_v49  ;;  %v916_v53 = vld [vmem:[#allocation3 + $0x288] sm:$0xff]  ;;  %v479_v56 = vld [vmem:[#allocation3 + $0x110] sm:$0xff]  ;;  %v480_v57 = vld [vmem:[#allocation3 + $0x118] sm:$0xff] }
  0x49   : > { %v917_v58 = vld [vmem:[#allocation3 + $0x290] sm:$0xff]  ;;  %v918_v59 = vld [vmem:[#allocation3 + $0x298] sm:$0xff]  ;;  %v481_v0 = vld [vmem:[#allocation3 + $0x120] sm:$0xff] }
  0x4a   : > { %1887 = vmatpush3.bf16.msra.mxu1 %v1884_v48  ;;  %v1916_v48 = vpack.c.bf16 %v216_v45, %v215_v44  ;;  %v482_v1 = vld [vmem:[#allocation3 + $0x128] sm:$0xff]  ;;  %v919_v2 = vld [vmem:[#allocation3 + $0x2a0] sm:$0xff]  ;;  %v483_v10 = vld [vmem:[#allocation3 + $0x130] sm:$0xff] }
  0x4b   : > { %1983 = vmatpush3.bf16.msra.mxu0 %v1980_v49  ;;  %1889 = vmatprep.subr.bf16.mxu1 %v1888_v54  ;;  %v2012_v49 = vpack.c.bf16 %v784_v47, %v783_v46  ;;  %v920_v3 = vld [vmem:[#allocation3 + $0x2a8] sm:$0xff]  ;;  %v484_v11 = vld [vmem:[#allocation3 + $0x138] sm:$0xff]  ;;  %v921_v12 = vld [vmem:[#allocation3 + $0x2b0] sm:$0xff] }
  0x4c   : > { %1985 = vmatprep.subr.bf16.mxu0 %v1984_v55  ;;  %v922_v13 = vld [vmem:[#allocation3 + $0x2b8] sm:$0xff]  ;;  %v485_v20 = vld [vmem:[#allocation3 + $0x140] sm:$0xff]  ;;  %v486_v21 = vld [vmem:[#allocation3 + $0x148] sm:$0xff] }
  0x4d   : > { %1581 = vmatmul.mubr.f32.vlgmr.msra.gmra.mrb[0].mxu1 %v1329_v60  ;;  %v1321_v60 = vld [vmem:[%s2282_s6 + $0x10] ss:$2 sm:$0xff]  ;;  %v923_v22 = vld [vmem:[#allocation3 + $0x2c0] sm:$0xff]  ;;  %v924_v23 = vld [vmem:[#allocation3 + $0x2c8] sm:$0xff] }
  0x4e   : > { %1891 = vmatpush3.bf16.msra.mxu1 %v1888_v54  ;;  %1713 = vmatmul.mubr.f32.vlgmr.msra.gmra.mrb[0].mxu0 %v1345_v61  ;;  %v1920_v54 = vpack.c.bf16 %v478_v51, %v477_v50  ;;  %v1353_v61 = vld [vmem:[%s2282_s6 + $0x14] ss:$2 sm:$0xff]  ;;  %v490_v39 = vld [vmem:[#allocation3 + $0x168] sm:$0xff] }
  0x4f   : > { %1987 = vmatpush3.bf16.msra.mxu0 %v1984_v55  ;;  %1893 = vmatprep.subr.bf16.mxu1 %v1892_v62  ;;  %v2016_v55 = vpack.c.bf16 %v916_v53, %v915_v52  ;;  %v487_v30 = vld [vmem:[#allocation3 + $0x150] sm:$0xff]  ;;  %v488_v31 = vld [vmem:[#allocation3 + $0x158] sm:$0xff]  ;;  %v489_v38 = vld [vmem:[#allocation3 + $0x160] sm:$0xff] }
  0x50   : > { %1989 = vmatprep.subr.bf16.mxu0 %v1988_v63  ;;  %1583 = vmatprep.mubr.f32.mxu1 %v1330_v4  ;;  %v1322_v4 = vld [vmem:[%s2282_s6 + $0x20] ss:$2 sm:$0xff]  ;;  %v925_v32 = vld [vmem:[#allocation3 + $0x2d0] sm:$0xff]  ;;  %v926_v33 = vld [vmem:[#allocation3 + $0x2d8] sm:$0xff] }
  0x51   : > { %1715 = vmatprep.mubr.f32.mxu0 %v1346_v5  ;;  %1584 = vmatmul.mubr.f32.gmra.mrb[2].mxu1 %v1331_v6  ;;  %v1354_v5 = vld [vmem:[%s2282_s6 + $0x24] ss:$2 sm:$0xff]  ;;  %v492_v45 = vld [vmem:[#allocation3 + $0x178] sm:$0xff] }
  0x52   : > { %1895 = vmatpush3.bf16.msra.mxu1 %v1892_v62  ;;  %1716 = vmatmul.mubr.f32.gmra.mrb[2].mxu0 %v1347_v8  ;;  %v1924_v62 = vpack.c.bf16 %v480_v57, %v479_v56  ;;  %v1323_v6 = vld [vmem:[%s2282_s6 + $0x30] ss:$2 sm:$0xff]  ;;  %v927_v40 = vld [vmem:[#allocation3 + $0x2e0] sm:$0xff]  ;;  %v928_v41 = vld [vmem:[#allocation3 + $0x2e8] sm:$0xff] }
  0x53   : > { %1991 = vmatpush3.bf16.msra.mxu0 %v1988_v63  ;;  %1897 = vmatprep.subr.bf16.mxu1 %v1896_v7  ;;  %v2020_v63 = vpack.c.bf16 %v918_v59, %v917_v58  ;;  %v1355_v8 = vld [vmem:[%s2282_s6 + $0x34] ss:$2 sm:$0xff]  ;;  %v1062_v51 = vld [vmem:[#allocation3 + $0x308] sm:$0xff]  ;;  %v1361_v56 = vld [vmem:[%s2282_s6 + $0x15] ss:$2 sm:$0xff] }
  0x54   : > { %1993 = vmatprep.subr.bf16.mxu0 %v1992_v9  ;;  %1586 = vmatprep.mubr.f32.mxu1 %v1332_v14  ;;  %v1324_v14 = vld [vmem:[%s2282_s6 + $0x40] ss:$2 sm:$0xff]  ;;  %v491_v44 = vld [vmem:[#allocation3 + $0x170] sm:$0xff]  ;;  %v930_v47 = vld [vmem:[#allocation3 + $0x2f8] sm:$0xff] }
  0x55   : > { %1718 = vmatprep.mubr.f32.mxu0 %v1348_v15  ;;  %1587 = vmatmul.mubr.f32.gmra.mrb[4].mxu1 %v1333_v16  ;;  %v1356_v15 = vld [vmem:[%s2282_s6 + $0x44] ss:$2 sm:$0xff]  ;;  %v1362_v59 = vld [vmem:[%s2282_s6 + $0x25] ss:$2 sm:$0xff] }
  0x56   : > { %1899 = vmatpush3.bf16.msra.mxu1 %v1896_v7  ;;  %1719 = vmatmul.mubr.f32.gmra.mrb[4].mxu0 %v1349_v18  ;;  %v1928_v7 = vpack.c.bf16 %v482_v1, %v481_v0  ;;  %v1325_v16 = vld [vmem:[%s2282_s6 + $0x50] ss:$2 sm:$0xff]  ;;  %v1061_v50 = vld [vmem:[#allocation3 + $0x300] sm:$0xff] }
  0x57   : > { %1995 = vmatpush3.bf16.msra.mxu0 %v1992_v9  ;;  %1901 = vmatprep.subr.bf16.mxu1 %v1900_v17  ;;  %v2024_v9 = vpack.c.bf16 %v920_v3, %v919_v2  ;;  %v1357_v18 = vld [vmem:[%s2282_s6 + $0x54] ss:$2 sm:$0xff]  ;;  %v2048_v52 = vpack.c.bf16 %v1062_v51, %v1061_v50  ;;  %v1364_v2 = vld [vmem:[%s2282_s6 + $0x45] ss:$2 sm:$0xff] }
  0x58   : > { %1997 = vmatprep.subr.bf16.mxu0 %v1996_v19  ;;  %1589 = vmatprep.mubr.f32.mxu1 %v1334_v24  ;;  %v1326_v24 = vld [vmem:[%s2282_s6 + $0x60] ss:$2 sm:$0xff]  ;;  %v929_v46 = vld [vmem:[#allocation3 + $0x2f0] sm:$0xff] }
  0x59   : > { %1721 = vmatprep.mubr.f32.mxu0 %v1350_v25  ;;  %1590 = vmatmul.mubr.f32.gmra.mrb[6].mxu1 %v1335_v26  ;;  %v1358_v25 = vld [vmem:[%s2282_s6 + $0x64] ss:$2 sm:$0xff] }
  0x5a   : > { %1903 = vmatpush3.bf16.msra.mxu1 %v1900_v17  ;;  %1722 = vmatmul.mubr.f32.gmra.mrb[6].mxu0 %v1351_v28  ;;  %v1932_v17 = vpack.c.bf16 %v484_v11, %v483_v10  ;;  %v1327_v26 = vld [vmem:[%s2282_s6 + $0x70] ss:$2 sm:$0xff]  ;;  %v1070_v10 = vld [vmem:[#allocation3 + $0x348] sm:$0xff] }
  0x5b   : > { %1999 = vmatpush3.bf16.msra.mxu0 %v1996_v19  ;;  %1905 = vmatprep.subr.bf16.mxu1 %v1904_v27  ;;  %v2028_v19 = vpack.c.bf16 %v922_v13, %v921_v12  ;;  %v1359_v28 = vld [vmem:[%s2282_s6 + $0x74] ss:$2 sm:$0xff]  ;;  %v1366_v11 = vld [vmem:[%s2282_s6 + $0x65] ss:$2 sm:$0xff]  ;;  %v1367_v13 = vld [vmem:[%s2282_s6 + $0x75] ss:$2 sm:$0xff] }
  0x5c   : > { %2001 = vmatprep.subr.bf16.mxu0 %v2000_v29  ;;  %1624 = vmatprep.mubr.f32.mxu1 %v186_v34  ;;  %v1336_v34 = vld [vmem:[%s2282_s6 + $0x2] ss:$2 sm:$0xff]  ;;  %v1343_v12 = vld [vmem:[%s2282_s6 + $0x72] ss:$2 sm:$0xff] }
  0x5d   : > { %1756 = vmatprep.mubr.f32.mxu0 %v1352_v35  ;;  %v1360_v35 = vld [vmem:[%s2282_s6 + $0x5] ss:$2 sm:$0xff]  ;;  %v1338_v57 = vld [vmem:[%s2282_s6 + $0x22] ss:$2 sm:$0xff] }
  0x5e   : > { %1907 = vmatpush3.bf16.msra.mxu1 %v1904_v27  ;;  %v1936_v27 = vpack.c.bf16 %v486_v21, %v485_v20  ;;  %v1063_v53 = vld [vmem:[#allocation3 + $0x310] sm:$0xff]  ;;  %v1073_v20 = vld [vmem:[#allocation3 + $0x360] sm:$0xff]  ;;  %v1074_v21 = vld [vmem:[#allocation3 + $0x368] sm:$0xff] }
  0x5f   : > { %2003 = vmatpush3.bf16.msra.mxu0 %v2000_v29  ;;  %1909 = vmatprep.subr.bf16.mxu1 %v1908_v36  ;;  %v2032_v29 = vpack.c.bf16 %v924_v23, %v923_v22  ;;  %v1340_v0 = vld [vmem:[%s2282_s6 + $0x42] ss:$2 sm:$0xff]  ;;  %v2072_v22 = vpack.c.bf16 %v1074_v21, %v1073_v20 }
  0x60   : > { %2005 = vmatprep.subr.bf16.mxu0 %v2004_v37  ;;  %v1067_v3 = vld [vmem:[#allocation3 + $0x330] sm:$0xff] }
  0x61   : > { %v1075_v23 = vld [vmem:[#allocation3 + $0x370] sm:$0xff] }
  0x62   : > { %1911 = vmatpush3.bf16.msra.mxu1 %v1908_v36  ;;  %v1940_v36 = vpack.c.bf16 %v488_v31, %v487_v30  ;;  %v1375_v30 = vld [vmem:[%s2282_s6 + $0x76] ss:$2 sm:$0xff] }
  0x63   : > { %2007 = vmatpush3.bf16.msra.mxu0 %v2004_v37  ;;  %1913 = vmatprep.subr.bf16.mxu1 %v1912_v42  ;;  %v2036_v37 = vpack.c.bf16 %v926_v33, %v925_v32  ;;  %v1371_v31 = vld [vmem:[%s2282_s6 + $0x36] ss:$2 sm:$0xff] }
  0x64   : > { %2009 = vmatprep.subr.bf16.mxu0 %v2008_v43 }
  0x66   : > { %1915 = vmatpush3.bf16.msra.mxu1 %v1912_v42  ;;  %v1944_v42 = vpack.c.bf16 %v490_v39, %v489_v38 }
  0x67   : > { %2011 = vmatpush3.bf16.msra.mxu0 %v2008_v43  ;;  %1917 = vmatprep.subr.bf16.mxu1 %v1916_v48  ;;  %v2040_v43 = vpack.c.bf16 %v928_v41, %v927_v40 }
  0x68   : > { %2013 = vmatprep.subr.bf16.mxu0 %v2012_v49 }
  0x6a   : > { %1919 = vmatpush3.bf16.msra.mxu1 %v1916_v48  ;;  %v1948_v48 = vpack.c.bf16 %v492_v45, %v491_v44 }
  0x6b   : > { %2015 = vmatpush3.bf16.msra.mxu0 %v2012_v49  ;;  %1921 = vmatprep.subr.bf16.mxu1 %v1920_v54  ;;  %v2044_v49 = vpack.c.bf16 %v930_v47, %v929_v46 }
  0x6c   : > { %2017 = vmatprep.subr.bf16.mxu0 %v2016_v55 }
  0x6d   : > { %1625 = vmatmul.mubr.f32.vlgmr.msra.gmra.mrb[0].mxu1 %v1321_v60  ;;  %v1065_v60 = vld [vmem:[#allocation3 + $0x320] sm:$0xff] }
  0x6e   : > { %1923 = vmatpush3.bf16.msra.mxu1 %v1920_v54  ;;  %1757 = vmatmul.mubr.f32.vlgmr.msra.gmra.mrb[0].mxu0 %v1353_v61  ;;  %v1064_v54 = vld [vmem:[#allocation3 + $0x318] sm:$0xff]  ;;  %v1066_v61 = vld [vmem:[#allocation3 + $0x328] sm:$0xff] }
  0x6f   : > { %2019 = vmatpush3.bf16.msra.mxu0 %v2016_v55  ;;  %1925 = vmatprep.subr.bf16.mxu1 %v1924_v62  ;;  %v1337_v55 = vld [vmem:[%s2282_s6 + $0x12] ss:$2 sm:$0xff]  ;;  %v2052_v58 = vpack.c.bf16 %v1064_v54, %v1063_v53  ;;  %v2056_v1 = vpack.c.bf16 %v1066_v61, %v1065_v60 }
  0x70   : > { %2021 = vmatprep.subr.bf16.mxu0 %v2020_v63  ;;  %1627 = vmatprep.mubr.f32.mxu1 %v1322_v4  ;;  %v1068_v4 = vld [vmem:[#allocation3 + $0x338] sm:$0xff] }
  0x71   : > { %1759 = vmatprep.mubr.f32.mxu0 %v1354_v5  ;;  %1628 = vmatmul.mubr.f32.gmra.mrb[2].mxu1 %v1323_v6  ;;  %v1341_v5 = vld [vmem:[%s2282_s6 + $0x52] ss:$2 sm:$0xff]  ;;  %v1365_v6 = vld [vmem:[%s2282_s6 + $0x55] ss:$2 sm:$0xff] }
  0x72   : > { %1927 = vmatpush3.bf16.msra.mxu1 %v1924_v62  ;;  %1760 = vmatmul.mubr.f32.gmra.mrb[2].mxu0 %v1355_v8  ;;  %v1339_v62 = vld [vmem:[%s2282_s6 + $0x32] ss:$2 sm:$0xff]  ;;  %v2060_v8 = vpack.c.bf16 %v1068_v4, %v1067_v3 }
  0x73   : > { %2023 = vmatpush3.bf16.msra.mxu0 %v2020_v63  ;;  %1929 = vmatprep.subr.bf16.mxu1 %v1928_v7  ;;  %v1363_v63 = vld [vmem:[%s2282_s6 + $0x35] ss:$2 sm:$0xff] }
  0x74   : > { %2025 = vmatprep.subr.bf16.mxu0 %v2024_v9  ;;  %1630 = vmatprep.mubr.f32.mxu1 %v1324_v14 }
  0x75   : > { %1762 = vmatprep.mubr.f32.mxu0 %v1356_v15  ;;  %1631 = vmatmul.mubr.f32.gmra.mrb[4].mxu1 %v1325_v16  ;;  %v1071_v15 = vld [vmem:[#allocation3 + $0x350] sm:$0xff]  ;;  %v1072_v16 = vld [vmem:[#allocation3 + $0x358] sm:$0xff] }
  0x76   : > { %1931 = vmatpush3.bf16.msra.mxu1 %v1928_v7  ;;  %1763 = vmatmul.mubr.f32.gmra.mrb[4].mxu0 %v1357_v18  ;;  %v1342_v7 = vld [vmem:[%s2282_s6 + $0x62] ss:$2 sm:$0xff] }
  0x77   : > { %2027 = vmatpush3.bf16.msra.mxu0 %v2024_v9  ;;  %1933 = vmatprep.subr.bf16.mxu1 %v1932_v17  ;;  %v1069_v9 = vld [vmem:[#allocation3 + $0x340] sm:$0xff] }
  0x78   : > { %2029 = vmatprep.subr.bf16.mxu0 %v2028_v19  ;;  %1633 = vmatprep.mubr.f32.mxu1 %v1326_v24  ;;  %v2064_v14 = vpack.c.bf16 %v1070_v10, %v1069_v9  ;;  %v1372_v18 = vld [vmem:[%s2282_s6 + $0x46] ss:$2 sm:$0xff]  ;;  %v1076_v24 = vld [vmem:[#allocation3 + $0x378] sm:$0xff] }
  0x79   : > { %1765 = vmatprep.mubr.f32.mxu0 %v1358_v25  ;;  %1634 = vmatmul.mubr.f32.gmra.mrb[6].mxu1 %v1327_v26  ;;  %v2076_v25 = vpack.c.bf16 %v1076_v24, %v1075_v23  ;;  %v1373_v26 = vld [vmem:[%s2282_s6 + $0x56] ss:$2 sm:$0xff] }
  0x7a   : > { %1935 = vmatpush3.bf16.msra.mxu1 %v1932_v17  ;;  %1766 = vmatmul.mubr.f32.gmra.mrb[6].mxu0 %v1359_v28  ;;  %v1368_v17 = vld [vmem:[%s2282_s6 + $0x6] ss:$2 sm:$0xff] }
  0x7b   : > { %2031 = vmatpush3.bf16.msra.mxu0 %v2028_v19  ;;  %1937 = vmatprep.subr.bf16.mxu1 %v1936_v27  ;;  %v2068_v19 = vpack.c.bf16 %v1072_v16, %v1071_v15  ;;  %v1374_v28 = vld [vmem:[%s2282_s6 + $0x66] ss:$2 sm:$0xff] }
  0x7c   : > { %2033 = vmatprep.subr.bf16.mxu0 %v2032_v29  ;;  %1668 = vmatprep.mubr.f32.mxu1 %v1336_v34 }
  0x7d   : > { %1800 = vmatprep.mubr.f32.mxu0 %v1360_v35 }
  0x7e   : > { %1939 = vmatpush3.bf16.msra.mxu1 %v1936_v27  ;;  %v1369_v27 = vld [vmem:[%s2282_s6 + $0x16] ss:$2 sm:$0xff] }
  0x7f   : > { %2035 = vmatpush3.bf16.msra.mxu0 %v2032_v29  ;;  %1941 = vmatprep.subr.bf16.mxu1 %v1940_v36  ;;  %v1370_v29 = vld [vmem:[%s2282_s6 + $0x26] ss:$2 sm:$0xff] }
  0x80   : > { %2037 = vmatprep.subr.bf16.mxu0 %v2036_v37 }
  0x82   : > { %1943 = vmatpush3.bf16.msra.mxu1 %v1940_v36 }
  0x83   : > { %2039 = vmatpush3.bf16.msra.mxu0 %v2036_v37  ;;  %1945 = vmatprep.subr.bf16.mxu1 %v1944_v42 }
  0x84   : > { %2041 = vmatprep.subr.bf16.mxu0 %v2040_v43 }
  0x86   : > { %1947 = vmatpush3.bf16.msra.mxu1 %v1944_v42 }
  0x87   : > { %2043 = vmatpush3.bf16.msra.mxu0 %v2040_v43  ;;  %1949 = vmatprep.subr.bf16.mxu1 %v1948_v48 }
  0x88   : > { %2045 = vmatprep.subr.bf16.mxu0 %v2044_v49 }
  0x8a   : > { %1951 = vmatpush3.bf16.msra.mxu1 %v1948_v48  ;;  %v1376_v48 = vld [vmem:[%s2352_s2] ss:$0 sm:$0xff] }
  0x8b   : > { %2047 = vmatpush3.bf16.msra.mxu0 %v2044_v49  ;;  %2080 = vmatprep.subr.bf16.mxu1 %v2048_v52 }
  0x8c   : > { %2049 = vmatprep.subr.bf16.mxu0 %v2048_v52 }
  0x8d   : > { %1669 = vmatmul.mubr.f32.vlgmr.msra.gmra.mrb[0].mxu1 %v1337_v55 }
  0x8e   : > { %1801 = vmatmul.mubr.f32.vlgmr.msra.gmra.mrb[0].mxu0 %v1361_v56  ;;  %2088 = vmatpush3.bf16.msra.mxu1 %v2048_v52 }
  0x8f   : > { %2051 = vmatpush3.bf16.msra.mxu0 %v2048_v52  ;;  %1671 = vmatprep.mubr.f32.mxu1 %v1338_v57 }
  0x90   : > { %1803 = vmatprep.mubr.f32.mxu0 %v1362_v59  ;;  %2053 = vmatprep.subr.bf16.mxu0 %v2052_v58 }
  0x91   : > { %1672 = vmatmul.mubr.f32.gmra.mrb[2].mxu1 %v1339_v62  ;;  %2081 = vmatprep.subr.bf16.mxu1 %v2052_v58 }
  0x92   : > { %1804 = vmatmul.mubr.f32.gmra.mrb[2].mxu0 %v1363_v63  ;;  %2089 = vmatpush3.bf16.msra.mxu1 %v2052_v58 }
  0x93   : > { %2055 = vmatpush3.bf16.msra.mxu0 %v2052_v58  ;;  %1674 = vmatprep.mubr.f32.mxu1 %v1340_v0 }
  0x94   : > { %1806 = vmatprep.mubr.f32.mxu0 %v1364_v2  ;;  %2057 = vmatprep.subr.bf16.mxu0 %v2056_v1 }
  0x95   : > { %1675 = vmatmul.mubr.f32.gmra.mrb[4].mxu1 %v1341_v5  ;;  %2082 = vmatprep.subr.bf16.mxu1 %v2056_v1 }
  0x96   : > { %1807 = vmatmul.mubr.f32.gmra.mrb[4].mxu0 %v1365_v6  ;;  %2090 = vmatpush3.bf16.msra.mxu1 %v2056_v1 }
  0x97   : > { %2059 = vmatpush3.bf16.msra.mxu0 %v2056_v1  ;;  %1677 = vmatprep.mubr.f32.mxu1 %v1342_v7 }
  0x98   : > { %1809 = vmatprep.mubr.f32.mxu0 %v1366_v11  ;;  %2061 = vmatprep.subr.bf16.mxu0 %v2060_v8 }
  0x99   : > { %1678 = vmatmul.mubr.f32.gmra.mrb[6].mxu1 %v1343_v12  ;;  %2083 = vmatprep.subr.bf16.mxu1 %v2060_v8 }
  0x9a   : > { %1810 = vmatmul.mubr.f32.gmra.mrb[6].mxu0 %v1367_v13  ;;  %2091 = vmatpush3.bf16.msra.mxu1 %v2060_v8 }
  0x9b   : > { %2063 = vmatpush3.bf16.msra.mxu0 %v2060_v8  ;;  %2084 = vmatprep.subr.bf16.mxu1 %v2064_v14 }
  0x9c   : > { %2065 = vmatprep.subr.bf16.mxu0 %v2064_v14  ;;  %1844 = vmatprep.mubr.f32.mxu0 %v1368_v17 }
  0x9d   : > { %1850 = vmatprep.mubr.f32.mxu1 %v1372_v18 }
  0x9e   : > { %2092 = vmatpush3.bf16.msra.mxu1 %v2064_v14 }
  0x9f   : > { %2067 = vmatpush3.bf16.msra.mxu0 %v2064_v14  ;;  %2085 = vmatprep.subr.bf16.mxu1 %v2068_v19 }
  0xa0   : > { %2069 = vmatprep.subr.bf16.mxu0 %v2068_v19 }
  0xa2   : > { %2093 = vmatpush3.bf16.msra.mxu1 %v2068_v19 }
  0xa3   : > { %2071 = vmatpush3.bf16.msra.mxu0 %v2068_v19  ;;  %2086 = vmatprep.subr.bf16.mxu1 %v2072_v22 }
  0xa4   : > { %2073 = vmatprep.subr.bf16.mxu0 %v2072_v22 }
  0xa6   : > { %2094 = vmatpush3.bf16.msra.mxu1 %v2072_v22 }
  0xa7   : > { %2075 = vmatpush3.bf16.msra.mxu0 %v2072_v22  ;;  %2087 = vmatprep.subr.bf16.mxu1 %v2076_v25 }
  0xa8   : > { %2077 = vmatprep.subr.bf16.mxu0 %v2076_v25 }
  0xaa   : > { %2095 = vmatpush3.bf16.msra.mxu1 %v2076_v25 }
  0xab   : > { %2079 = vmatpush3.bf16.msra.mxu0 %v2076_v25 }
  0xad   : > { %1851 = vmatmul.mubr.f32.vlgmr.msra.gmra.mrb[8].mxu1 %v1373_v26 }
  0xae   : > { %1845 = vmatmul.mubr.f32.vlgmr.msra.gmra.mrb[0].mxu0 %v1369_v27  ;;  %1853 = vmatprep.mubr.f32.mxu1 %v1374_v28 }
  0xaf   : > { %1847 = vmatprep.mubr.f32.mxu0 %v1370_v29 }
  0xb1   : > { %1854 = vmatmul.mubr.f32.gmra.mrb[10].mxu1 %v1375_v30 }
  0xb2   : > { %1848 = vmatmul.mubr.f32.gmra.mrb[2].mxu0 %v1371_v31 }
 0x160   : > { %v1670_v32 = vpop.f32.mrb[0].mxu1 }
 0x161   : > { %v559_v33 = vpop.f32.mrb[1].mxu1 }
 0x164   : > { %v1673_v34 = vpop.f32.mrb[2].mxu1 }
 0x165   : > { %v569_v35 = vpop.f32.mrb[3].mxu1 }
 0x168   : > { %v1676_v36 = vpop.f32.mrb[4].mxu1 }
 0x169   : > { %v1808_v37 = vpop.f32.mrb[4].mxu0  ;;  %v579_v38 = vpop.f32.mrb[5].mxu1 }
 0x16a   : > { %v2100_v39 = vadd.f32 %v1808_v37, %v1676_v36  ;;  %v1017_v40 = vpop.f32.mrb[5].mxu0 }
 0x16b   : > { %v2102_v41 = vadd.f32 %v1017_v40, %v579_v38 }
 0x16c   : > { %v1679_v42 = vpop.f32.mrb[6].mxu1 }
 0x16d   : > { %v1811_v43 = vpop.f32.mrb[6].mxu0  ;;  %v589_v44 = vpop.f32.mrb[7].mxu1 }
 0x16e   : > { %v2104_v45 = vadd.f32 %v1811_v43, %v1679_v42  ;;  %v1027_v46 = vpop.f32.mrb[7].mxu0 }
 0x16f   : > { %v2106_v47 = vadd.f32 %v1027_v46, %v589_v44 }
 0x180   : > { %v1852_v49 = vpop.f32.mrb[8].mxu1 }
 0x181   : > { %v1846_v50 = vpop.f32.mrb[0].mxu0  ;;  %v2101_v51 = vadd.f32 %v2100_v39, %v1852_v49  ;;  %v1163_v52 = vpop.f32.mrb[9].mxu1 }
 0x182   : > { %v2096_v53 = vadd.f32 %v1846_v50, %v1670_v32  ;;  %v1143_v54 = vpop.f32.mrb[1].mxu0  ;;  %v2103_v55 = vadd.f32 %v2102_v41, %v1163_v52 }
 0x183   : > { %v1202_v56 = vadd.f32 %v2101_v51, %v1376_v48  ;;  %v2097_v57 = vadd.f32 %v1143_v54, %v559_v33 }
 0x184   : > { %v1198_v58 = vadd.f32 %v2096_v53, %v1376_v48  ;;  %v1201_v59 = vadd.f32 %v2103_v55, %v1376_v48  ;;  %v1855_v60 = vpop.f32.mrb[10].mxu1 }
 0x185   : > { %v1210_v61 = vmax.f32 %v1202_v56, 0.0  ;;  %v1197_v62 = vadd.f32 %v2097_v57, %v1376_v48  ;;  %v1849_v63 = vpop.f32.mrb[2].mxu0  ;;  %v2105_v0 = vadd.f32 %v2104_v45, %v1855_v60  ;;  %v1173_v1 = vpop.f32.mrb[11].mxu1 }
 0x186   : > { %v1206_v2 = vmax.f32 %v1198_v58, 0.0  ;;  %v1209_v3 = vmax.f32 %v1201_v59, 0.0  ;;  %v2098_v4 = vadd.f32 %v1849_v63, %v1673_v34  ;;  %v1153_v5 = vpop.f32.mrb[3].mxu0  ;;  %v2107_v6 = vadd.f32 %v2106_v47, %v1173_v1 }
 0x187   : > { %1218 = vst [vmem:[#allocation2 + $0x28] sm:$0xff] %v1210_v61  ;;  %v1205_v7 = vmax.f32 %v1197_v62, 0.0  ;;  %v1204_v8 = vadd.f32 %v2105_v0, %v1376_v48  ;;  %v2099_v9 = vadd.f32 %v1153_v5, %v569_v35 }
 0x188   : > { %1214 = vst [vmem:[#allocation2 + $0x8] sm:$0xff] %v1206_v2  ;;  %1217 = vst [vmem:[#allocation2 + $0x20] sm:$0xff] %v1209_v3  ;;  %v1200_v10 = vadd.f32 %v2098_v4, %v1376_v48  ;;  %v1203_v11 = vadd.f32 %v2107_v6, %v1376_v48 }
 0x189   : > { %1213 = vst [vmem:[#allocation2] sm:$0xff] %v1205_v7  ;;  %v1212_v12 = vmax.f32 %v1204_v8, 0.0  ;;  %v1199_v13 = vadd.f32 %v2099_v9, %v1376_v48 }
 0x18a   : > { %v1208_v14 = vmax.f32 %v1200_v10, 0.0  ;;  %v1211_v15 = vmax.f32 %v1203_v11, 0.0 }
 0x18b   : > { %1220 = vst [vmem:[#allocation2 + $0x38] sm:$0xff] %v1212_v12  ;;  %v1207_v16 = vmax.f32 %v1199_v13, 0.0 }
 0x18c   : > { %1216 = vst [vmem:[#allocation2 + $0x18] sm:$0xff] %v1208_v14  ;;  %1219 = vst [vmem:[#allocation2 + $0x30] sm:$0xff] %v1211_v15 }
 0x18d   : > { %1215 = vst [vmem:[#allocation2 + $0x10] sm:$0xff] %v1207_v16 }
 0x18f   : > { %v1225_v17 = vld [vmem:[#allocation2 + $0x20] ss:$2 sm:$0xff]  ;;  %v1233_v18 = vld [vmem:[#allocation2 + $0x21] ss:$2 sm:$0xff] }
 0x190   : > { %v1221_v19 = vld [vmem:[#allocation2] ss:$2 sm:$0xff]  ;;  %v1229_v20 = vld [vmem:[#allocation2 + $0x1] ss:$2 sm:$0xff]  ;;  %v1238_v21 = vmax.f32 %v1225_v17, %v1233_v18 }
 0x191   : > { %v1236_v22 = vmax.f32 %v1221_v19, %v1229_v20 }
 0x192   : > { %1242 = vst [vmem:[%s185_s14 + $0x10] sm:$0xff] %v1238_v21 }
 0x193   : > { %1240 = vst [vmem:[%s185_s14] sm:$0xff] %v1236_v22  ;;  %v1227_v23 = vld [vmem:[#allocation2 + $0x30] ss:$2 sm:$0xff]  ;;  %v1235_v24 = vld [vmem:[#allocation2 + $0x31] ss:$2 sm:$0xff] }
 0x194   : > { %v1223_v25 = vld [vmem:[#allocation2 + $0x10] ss:$2 sm:$0xff]  ;;  %v1231_v26 = vld [vmem:[#allocation2 + $0x11] ss:$2 sm:$0xff]  ;;  %v1239_v27 = vmax.f32 %v1227_v23, %v1235_v24 }
 0x195   : > { %v1237_v28 = vmax.f32 %v1223_v25, %v1231_v26 }
 0x196   : > { %1243 = vst [vmem:[%s185_s14 + $0x18] sm:$0xff] %v1239_v27 }
 0x197   : > { %1241 = vst [vmem:[%s185_s14 + $0x8] sm:$0xff] %v1237_v28 }
 0x198 PF: > { %s14_s12 = sadd.s32 1, %s2204_s12  }
 0x199   : > { %p11_p3 = scmp.ge.s32.totalorder %s14_s12, 4  }
 0x19b   :  { %13 = sbr.rel (!%p11_p3) target bundleno = 1 (0x1), region = 135 }
 0x1a2   :  { %1265 = vsyncpa [#allocation4], 1 }
 0x1a3   :  { %1267 = vsyncpa [#allocation4 + $0x1], 1 }

// kernel: _lambda_.7
= control target key start
LH: loop header
LB: loop body
LE: loop exit
PB: predicated region body
PF: predicated region fallthrough
CT: control target
= control target key end

     0   :  { %s380_s0 = inlined_call_operand.vmem [shape: f32[2,256], index: 0, kind: input, shape index: {}]   ;;  %s381_s1 = inlined_call_operand.vmem [shape: f32[256,128], index: 1, kind: input, shape index: {}]   ;;  %s382_s2 = inlined_call_operand.vmem [shape: f32[1,128], index: 2, kind: input, shape index: {}]   ;;  %s383_s3 = inlined_call_operand.hbm [shape: f32[2,128], index: 3, kind: output, shape index: {}]  }
   0x1   :  { %v32_v0 = vld [vmem:[%s381_s1 + $0x80] sm:$0xff]  ;;  %v33_v1 = vld [vmem:[%s381_s1 + $0x88] sm:$0xff]  ;;  %v34_v5 = vld [vmem:[%s381_s1 + $0x90] sm:$0xff] }
   0x2   :  { %v16_v2 = vld [vmem:[%s381_s1] sm:$0xff]  ;;  %v188_v3 = vpack.c.bf16 %v33_v1, %v32_v0  ;;  %v17_v4 = vld [vmem:[%s381_s1 + $0x8] sm:$0xff]  ;;  %v35_v6 = vld [vmem:[%s381_s1 + $0x98] sm:$0xff] }
   0x3   :  { %v190_v7 = vpack.c.bf16 %v17_v4, %v16_v2  ;;  %v192_v8 = vpack.c.bf16 %v35_v6, %v34_v5  ;;  %v18_v9 = vld [vmem:[%s381_s1 + $0x10] sm:$0xff]  ;;  %v19_v10 = vld [vmem:[%s381_s1 + $0x18] sm:$0xff]  ;;  %v36_v11 = vld [vmem:[%s381_s1 + $0xa0] sm:$0xff] }
   0x4   :  { %189 = vmatprep.subr.bf16.mxu0 %v188_v3  ;;  %v37_v12 = vld [vmem:[%s381_s1 + $0xa8] sm:$0xff]  ;;  %v194_v13 = vpack.c.bf16 %v19_v10, %v18_v9  ;;  %v20_v15 = vld [vmem:[%s381_s1 + $0x20] sm:$0xff]  ;;  %v38_v17 = vld [vmem:[%s381_s1 + $0xb0] sm:$0xff] }
   0x5   :  { %191 = vmatpush3.bf16.msra.mxu0 %v190_v7  ;;  %v196_v14 = vpack.c.bf16 %v37_v12, %v36_v11  ;;  %v21_v16 = vld [vmem:[%s381_s1 + $0x28] sm:$0xff]  ;;  %v39_v18 = vld [vmem:[%s381_s1 + $0xb8] sm:$0xff]  ;;  %v22_v21 = vld [vmem:[%s381_s1 + $0x30] sm:$0xff] }
   0x6   :  { %193 = vmatprep.subr.bf16.mxu0 %v192_v8  ;;  %v198_v19 = vpack.c.bf16 %v21_v16, %v20_v15  ;;  %v200_v20 = vpack.c.bf16 %v39_v18, %v38_v17  ;;  %v23_v22 = vld [vmem:[%s381_s1 + $0x38] sm:$0xff]  ;;  %v40_v23 = vld [vmem:[%s381_s1 + $0xc0] sm:$0xff]  ;;  %v41_v24 = vld [vmem:[%s381_s1 + $0xc8] sm:$0xff] }
   0x7   :  { %v152_v25 = vld.sshfl [vmem:[%s380_s0] sm:$0x33 pattern:$0x76325410] }
   0x8   :  { %v63_v26 = vcombine.high %v152_v25, %v152_v25 }
   0x9   :  { %195 = vmatpush3.bf16.msra.mxu0 %v194_v13 }
   0xa   :  { %197 = vmatprep.subr.bf16.mxu0 %v196_v14 }
   0xb   :  { %8 = vsyncpa [#allocation3], 0  ;;  %v202_v27 = vpack.c.bf16 %v23_v22, %v22_v21  ;;  %v204_v28 = vpack.c.bf16 %v41_v24, %v40_v23  ;;  %v24_v29 = vld [vmem:[%s381_s1 + $0x40] sm:$0xff]  ;;  %v25_v30 = vld [vmem:[%s381_s1 + $0x48] sm:$0xff]  ;;  %130 = vmatprep.mubr.f32.mxu0 %v63_v26  ;;  %s245_s25 = smov [#allocation2]  }
   0xc   :  { %v42_v31 = vld [vmem:[%s381_s1 + $0xd0] sm:$0xff]  ;;  %v43_v32 = vld [vmem:[%s381_s1 + $0xd8] sm:$0xff]  ;;  %v206_v33 = vpack.c.bf16 %v25_v30, %v24_v29  ;;  %v44_v37 = vld [vmem:[%s381_s1 + $0xe0] sm:$0xff]  ;;  %s143_s26 = sshll.u32 %s245_s25, 4  ;;  %s144_s26 = int_to_ptr.vmem [resolvable:$true] %s143_s26 }
   0xd   :  { %199 = vmatpush3.bf16.msra.mxu0 %v198_v19  ;;  %v208_v34 = vpack.c.bf16 %v43_v32, %v42_v31  ;;  %v26_v35 = vld [vmem:[%s381_s1 + $0x50] sm:$0xff]  ;;  %v27_v36 = vld [vmem:[%s381_s1 + $0x58] sm:$0xff]  ;;  %v45_v38 = vld [vmem:[%s381_s1 + $0xe8] sm:$0xff]  ;;  %s221_s27 = scalar_lea.vmem %s144_s26, 32  ;;  %p226_p1 = scmp.lt.s32.totalorder %s144_s26, %s144_s26 }
   0xe   :  { %201 = vmatprep.subr.bf16.mxu0 %v200_v20  ;;  %v210_v39 = vpack.c.bf16 %v27_v36, %v26_v35  ;;  %v212_v40 = vpack.c.bf16 %v45_v38, %v44_v37  ;;  %v28_v41 = vld [vmem:[%s381_s1 + $0x60] sm:$0xff]  ;;  %v29_v42 = vld [vmem:[%s381_s1 + $0x68] sm:$0xff]  ;;  %v46_v43 = vld [vmem:[%s381_s1 + $0xf0] sm:$0xff]  ;;  %p222_p0 = scmp.ne.s32.totalorder %s144_s26, %s221_s27  ;;  %p227_p2 = scmp.lt.s32.totalorder %s221_s27, %s221_s27 }
   0xf   :  { %v47_v44 = vld [vmem:[%s381_s1 + $0xf8] sm:$0xff]  ;;  %v214_v45 = vpack.c.bf16 %v29_v42, %v28_v41  ;;  %v30_v47 = vld [vmem:[%s381_s1 + $0x70] sm:$0xff]  ;;  %v151_v52 = vld [vmem:[%s382_s2] ss:$0 sm:$0xff] }
  0x10   :  { %v216_v46 = vpack.c.bf16 %v47_v44, %v46_v43  ;;  %v31_v48 = vld [vmem:[%s381_s1 + $0x78] sm:$0xff]  ;;  %p228_p3 = por %p227_p2, %p226_p1 }
  0x11   :  { %203 = vmatpush3.bf16.msra.mxu0 %v202_v27  ;;  %v218_v49 = vpack.c.bf16 %v31_v48, %v30_v47 }
  0x12   :  { %205 = vmatprep.subr.bf16.mxu0 %v204_v28  ;;  %p229_p4 = pnand %p228_p3, %p222_p0 }
  0x15   :  { %207 = vmatpush3.bf16.msra.mxu0 %v206_v33 }
  0x16   :  { %209 = vmatprep.subr.bf16.mxu0 %v208_v34 }
  0x19   :  { %211 = vmatpush3.bf16.msra.mxu0 %v210_v39 }
  0x1a   :  { %213 = vmatprep.subr.bf16.mxu0 %v212_v40 }
  0x1d   :  { %215 = vmatpush3.bf16.msra.mxu0 %v214_v45 }
  0x1e   :  { %217 = vmatprep.subr.bf16.mxu0 %v216_v46 }
  0x21   :  { %219 = vmatpush3.bf16.msra.mxu0 %v218_v49 }
  0x24   :  { %131 = vmatmul.mubr.f32.vlgmr.msra.gmra.mrb[0].mxu0 %v152_v25 }
  0xf7   :  { %v185_v50 = vpop.f32.mrb[0].mxu0 }
  0xf8   :  { %v186_v51 = vpop.f32.mrb[1].mxu0 }
  0xf9   :  { %v187_v53 = vadd.f32 %v186_v51, %v185_v50 }
  0xfb   :  { %v133_v54 = vadd.f32 %v187_v53, %v151_v52 }
  0xfd   :  { %136 = vst [vmem:[#allocation2] sm:$0x3] %v133_v54 }
  0xfe   :  { %232 = shalt.err (!%p229_p4)
}
  0xff   :  { %s233_s0 = scalar_lea.hbm %s383_s3, 32 }
 0x100   :  { %p234_p5 = scmp.ne.s32.totalorder %s383_s3, %s233_s0  ;;  %p237_p6 = scmp.lt.u32.totalorder %s233_s0, %s383_s3 }
 0x102   :  { %p239_p7 = pnand %p237_p6, %p234_p5 }
 0x104   :  { %242 = shalt.err (!%p239_p7)
}
 0x105   :  { %146 = dma.vmem_to_hbm [thread:$0]  %s144_s26, 32, %s383_s3, [#allocation3]  }
 0x106   :  { %243 = dma.done.wait [#allocation3], 32  }
 0x107   :  { %244 = vsyncadd [#allocation3], 4294967264 }
 0x108   :  { %150 = vsyncpa [#allocation3], 1 }

// kernel: _lambda_.5
= control target key start
LH: loop header
LB: loop body
LE: loop exit
PB: predicated region body
PF: predicated region fallthrough
CT: control target
= control target key end

     0   :  { %s1683_s12 = smov 0   ;;  %s2059_s0 = inlined_call_operand.vmem [shape: f32[2,38,128], index: 0, kind: input, shape index: {}]   ;;  %s2060_s1 = inlined_call_operand.vmem [shape: f32[7,128,128], index: 1, kind: input, shape index: {}]   ;;  %s2061_s2 = inlined_call_operand.vmem [shape: f32[1,128], index: 2, kind: input, shape index: {}]   ;;  %s2062_s3 = inlined_call_operand.vmem [shape: f32[2,8,128], index: 3, kind: output, shape index: {}]  }
   0x1 LB: > { %s920_s13 = sadd.s32 4294967295, %s1661_s12   ;;  %p924_p0 = scmp.ge.s32.totalorder %s1661_s12, 1  ;;  %s1661_s12 = sphi %s1683_s12, %s13_s12  }
   0x2   : > { %p137_p1 = scmp.lt.s32.totalorder %s1661_s12, 3 }
   0x4   : > { %p138_p2 = pnand %p924_p0, %p137_p1 }
   0x5   : > { %v930_v0 = vld [vmem:[%s2060_s1 + $0x80] sm:$0xff] (!%p138_p2)  ;;  %v931_v1 = vld [vmem:[%s2060_s1 + $0x88] sm:$0xff] (!%p138_p2)  ;;  %p160_p3 = scmp.lt.s32.totalorder (!%p138_p2), %s920_s13, 1  ;;  %v932_v5 = vld [vmem:[%s2060_s1 + $0x90] sm:$0xff] (!%p138_p2) }
   0x6   : > { %141 = sbr.rel (%p138_p2) target bundleno = 367 (0x16f), region = 32  ;;  %v966_v2 = vld [vmem:[%s2060_s1 + $0x180] sm:$0xff] (!%p138_p2)  ;;  %v1410_v3 = vpack.c.bf16 (!%p138_p2), %v931_v1, %v930_v0  ;;  %v967_v4 = vld [vmem:[%s2060_s1 + $0x188] sm:$0xff] (!%p138_p2)  ;;  %v933_v6 = vld [vmem:[%s2060_s1 + $0x98] sm:$0xff] (!%p138_p2) }
   0x7   : > { %v1506_v7 = vpack.c.bf16 (!%p138_p2), %v967_v4, %v966_v2  ;;  %v1414_v8 = vpack.c.bf16 (!%p138_p2), %v933_v6, %v932_v5  ;;  %v968_v9 = vld [vmem:[%s2060_s1 + $0x190] sm:$0xff] (!%p138_p2)  ;;  %v969_v10 = vld [vmem:[%s2060_s1 + $0x198] sm:$0xff] (!%p138_p2)  ;;  %v934_v11 = vld [vmem:[%s2060_s1 + $0xa0] sm:$0xff] (!%p138_p2) }
   0x8   : > { %1411 = vmatprep.subr.bf16.mxu1 (!%p138_p2), %v1410_v3  ;;  %v1510_v12 = vpack.c.bf16 (!%p138_p2), %v969_v10, %v968_v9  ;;  %v935_v13 = vld [vmem:[%s2060_s1 + $0xa8] sm:$0xff] (!%p138_p2)  ;;  %v970_v14 = vld [vmem:[%s2060_s1 + $0x1a0] sm:$0xff] (!%p138_p2)  ;;  %v936_v18 = vld [vmem:[%s2060_s1 + $0xb0] sm:$0xff] (!%p138_p2) }
   0x9   : > { %v971_v15 = vld [vmem:[%s2060_s1 + $0x1a8] sm:$0xff] (!%p138_p2)  ;;  %1507 = vmatprep.subr.bf16.mxu0 (!%p138_p2), %v1506_v7  ;;  %1413 = vmatpush3.bf16.msra.mxu1 (!%p138_p2), %v1410_v3  ;;  %v1418_v16 = vpack.c.bf16 (!%p138_p2), %v935_v13, %v934_v11  ;;  %v937_v19 = vld [vmem:[%s2060_s1 + $0xb8] sm:$0xff] (!%p138_p2)  ;;  %v972_v20 = vld [vmem:[%s2060_s1 + $0x1b0] sm:$0xff] (!%p138_p2) }
   0xa   : > { %1509 = vmatpush3.bf16.msra.mxu0 (!%p138_p2), %v1506_v7  ;;  %1415 = vmatprep.subr.bf16.mxu1 (!%p138_p2), %v1414_v8  ;;  %v1514_v17 = vpack.c.bf16 (!%p138_p2), %v971_v15, %v970_v14  ;;  %v973_v21 = vld [vmem:[%s2060_s1 + $0x1b8] sm:$0xff] (!%p138_p2)  ;;  %v1422_v22 = vpack.c.bf16 (!%p138_p2), %v937_v19, %v936_v18  ;;  %v938_v24 = vld [vmem:[%s2060_s1 + $0xc0] sm:$0xff] (!%p138_p2)  ;;  %v939_v25 = vld [vmem:[%s2060_s1 + $0xc8] sm:$0xff] (!%p138_p2) }
   0xb   : > { %1511 = vmatprep.subr.bf16.mxu0 (!%p138_p2), %v1510_v12  ;;  %v1518_v23 = vpack.c.bf16 (!%p138_p2), %v973_v21, %v972_v20  ;;  %v974_v27 = vld [vmem:[%s2060_s1 + $0x1c0] sm:$0xff] (!%p138_p2)  ;;  %v975_v28 = vld [vmem:[%s2060_s1 + $0x1c8] sm:$0xff] (!%p138_p2)  ;;  %v1426_v30 = vpack.c.bf16 (!%p138_p2), %v939_v25, %v938_v24  ;;  %v940_v32 = vld [vmem:[%s2060_s1 + $0xd0] sm:$0xff] (!%p138_p2) }
   0xc   : > { %v1522_v31 = vpack.c.bf16 (!%p138_p2), %v975_v28, %v974_v27  ;;  %v941_v33 = vld [vmem:[%s2060_s1 + $0xd8] sm:$0xff] (!%p138_p2)  ;;  %v976_v34 = vld [vmem:[%s2060_s1 + $0x1d0] sm:$0xff] (!%p138_p2)  ;;  %v942_v38 = vld [vmem:[%s2060_s1 + $0xe0] sm:$0xff] (!%p138_p2) }
   0xd   : > { %s2064_s13 = smov (!%p160_p3, %s920_s13), 1  ;;  %1417 = vmatpush3.bf16.msra.mxu1 %v1414_v8  ;;  %v977_v35 = vld [vmem:[%s2060_s1 + $0x1d8] sm:$0xff]  ;;  %v1430_v36 = vpack.c.bf16 %v941_v33, %v940_v32  ;;  %v943_v39 = vld [vmem:[%s2060_s1 + $0xe8] sm:$0xff]  ;;  %v978_v40 = vld [vmem:[%s2060_s1 + $0x1e0] sm:$0xff] }
   0xe   : > { %s1646_s11 = smul.u32 40, %s2064_s13  ;;  %1513 = vmatpush3.bf16.msra.mxu0 %v1510_v12  ;;  %1419 = vmatprep.subr.bf16.mxu1 %v1418_v16  ;;  %v1526_v37 = vpack.c.bf16 %v977_v35, %v976_v34  ;;  %v979_v41 = vld [vmem:[%s2060_s1 + $0x1e8] sm:$0xff]  ;;  %v1434_v42 = vpack.c.bf16 %v943_v39, %v942_v38  ;;  %v944_v44 = vld [vmem:[%s2060_s1 + $0xf0] sm:$0xff]  ;;  %v945_v45 = vld [vmem:[%s2060_s1 + $0xf8] sm:$0xff]  ;;  %s926_s27 = sshll.u32 %s2064_s13, 3 }
   0xf   : > { %1515 = vmatprep.subr.bf16.mxu0 %v1514_v17  ;;  %v1530_v43 = vpack.c.bf16 %v979_v41, %v978_v40  ;;  %v980_v46 = vld [vmem:[%s2060_s1 + $0x1f0] sm:$0xff]  ;;  %v981_v47 = vld [vmem:[%s2060_s1 + $0x1f8] sm:$0xff]  ;;  %v1438_v48 = vpack.c.bf16 %v945_v45, %v944_v44  ;;  %v172_v50 = vld [vmem:[%s2060_s1] sm:$0xff]  ;;  %s168_s29 = scalar_lea.vmem %s2062_s3, %s926_s27 }
  0x10   : > { %s1745_s24 = scalar_lea.vmem %s2059_s0, %s1646_s11  ;;  %v1534_v49 = vpack.c.bf16 %v981_v47, %v980_v46  ;;  %v173_v51 = vld [vmem:[%s2060_s1 + $0x8] sm:$0xff]  ;;  %v984_v52 = vld [vmem:[%s2060_s1 + $0x200] sm:$0xff]  ;;  %v174_v56 = vld [vmem:[%s2060_s1 + $0x10] sm:$0xff] }
  0x11   : > { %v928_v26 = vld [vmem:[%s1745_s24 + $0x1] ss:$2 sm:$0xff]  ;;  %1421 = vmatpush3.bf16.msra.mxu1 %v1418_v16  ;;  %v1442_v54 = vpack.c.bf16 %v173_v51, %v172_v50  ;;  %v175_v57 = vld [vmem:[%s2060_s1 + $0x18] sm:$0xff]  ;;  %v986_v58 = vld [vmem:[%s2060_s1 + $0x210] sm:$0xff] }
  0x12   : > { %1197 = vmatprep.mubr.f32.mxu1 %v928_v26  ;;  %v964_v29 = vld [vmem:[%s1745_s24 + $0x3] ss:$2 sm:$0xff]  ;;  %1517 = vmatpush3.bf16.msra.mxu0 %v1514_v17  ;;  %v987_v59 = vld [vmem:[%s2060_s1 + $0x218] sm:$0xff]  ;;  %v1446_v62 = vpack.c.bf16 %v175_v57, %v174_v56  ;;  %v169_v4 = vld [vmem:[%s1745_s24] ss:$2 sm:$0xff] }
  0x13   : > { %1302 = vmatprep.mubr.f32.mxu0 %v964_v29  ;;  %1423 = vmatprep.subr.bf16.mxu1 %v1422_v22  ;;  %v985_v53 = vld [vmem:[%s2060_s1 + $0x208] sm:$0xff]  ;;  %v929_v60 = vld [vmem:[%s1745_s24 + $0x11] ss:$2 sm:$0xff]  ;;  %v1542_v63 = vpack.c.bf16 %v987_v59, %v986_v58  ;;  %v176_v0 = vld [vmem:[%s2060_s1 + $0x20] sm:$0xff] }
  0x14   : > { %1519 = vmatprep.subr.bf16.mxu0 %v1518_v23  ;;  %v1538_v55 = vpack.c.bf16 %v985_v53, %v984_v52  ;;  %v965_v61 = vld [vmem:[%s1745_s24 + $0x13] ss:$2 sm:$0xff]  ;;  %v177_v1 = vld [vmem:[%s2060_s1 + $0x28] sm:$0xff] }
  0x15   : > { %1425 = vmatpush3.bf16.msra.mxu1 %v1422_v22  ;;  %v988_v2 = vld [vmem:[%s2060_s1 + $0x220] sm:$0xff]  ;;  %v989_v3 = vld [vmem:[%s2060_s1 + $0x228] sm:$0xff]  ;;  %v1450_v6 = vpack.c.bf16 %v177_v1, %v176_v0  ;;  %v178_v8 = vld [vmem:[%s2060_s1 + $0x30] sm:$0xff] }
  0x16   : > { %1521 = vmatpush3.bf16.msra.mxu0 %v1518_v23  ;;  %1427 = vmatprep.subr.bf16.mxu1 %v1426_v30  ;;  %v982_v5 = vld [vmem:[%s1745_s24 + $0x4] ss:$2 sm:$0xff]  ;;  %v1546_v7 = vpack.c.bf16 %v989_v3, %v988_v2  ;;  %v179_v9 = vld [vmem:[%s2060_s1 + $0x38] sm:$0xff]  ;;  %v1000_v57 = vld [vmem:[%s1745_s24 + $0x5] ss:$2 sm:$0xff] }
  0x17   : > { %1523 = vmatprep.subr.bf16.mxu0 %v1522_v31  ;;  %v990_v10 = vld [vmem:[%s2060_s1 + $0x230] sm:$0xff]  ;;  %v991_v11 = vld [vmem:[%s2060_s1 + $0x238] sm:$0xff]  ;;  %v1454_v12 = vpack.c.bf16 %v179_v9, %v178_v8  ;;  %v180_v14 = vld [vmem:[%s2060_s1 + $0x40] sm:$0xff] }
  0x18   : > { %v1550_v13 = vpack.c.bf16 %v991_v11, %v990_v10  ;;  %v181_v15 = vld [vmem:[%s2060_s1 + $0x48] sm:$0xff]  ;;  %v992_v16 = vld [vmem:[%s2060_s1 + $0x240] sm:$0xff]  ;;  %v182_v20 = vld [vmem:[%s2060_s1 + $0x50] sm:$0xff] }
  0x19   : > { %1429 = vmatpush3.bf16.msra.mxu1 %v1426_v30  ;;  %v993_v17 = vld [vmem:[%s2060_s1 + $0x248] sm:$0xff]  ;;  %v1458_v18 = vpack.c.bf16 %v181_v15, %v180_v14  ;;  %v183_v21 = vld [vmem:[%s2060_s1 + $0x58] sm:$0xff]  ;;  %v994_v22 = vld [vmem:[%s2060_s1 + $0x250] sm:$0xff] }
  0x1a   : > { %1525 = vmatpush3.bf16.msra.mxu0 %v1522_v31  ;;  %1431 = vmatprep.subr.bf16.mxu1 %v1430_v36  ;;  %v1554_v19 = vpack.c.bf16 %v993_v17, %v992_v16  ;;  %v995_v23 = vld [vmem:[%s2060_s1 + $0x258] sm:$0xff]  ;;  %v1462_v24 = vpack.c.bf16 %v183_v21, %v182_v20  ;;  %v184_v26 = vld [vmem:[%s2060_s1 + $0x60] sm:$0xff]  ;;  %v185_v27 = vld [vmem:[%s2060_s1 + $0x68] sm:$0xff] }
  0x1b   : > { %1527 = vmatprep.subr.bf16.mxu0 %v1526_v37  ;;  %v1558_v25 = vpack.c.bf16 %v995_v23, %v994_v22  ;;  %v996_v28 = vld [vmem:[%s2060_s1 + $0x260] sm:$0xff]  ;;  %v997_v29 = vld [vmem:[%s2060_s1 + $0x268] sm:$0xff]  ;;  %v1466_v30 = vpack.c.bf16 %v185_v27, %v184_v26  ;;  %v186_v32 = vld [vmem:[%s2060_s1 + $0x70] sm:$0xff] }
  0x1c   : > { %v1562_v31 = vpack.c.bf16 %v997_v29, %v996_v28  ;;  %v187_v33 = vld [vmem:[%s2060_s1 + $0x78] sm:$0xff]  ;;  %v998_v34 = vld [vmem:[%s2060_s1 + $0x270] sm:$0xff]  ;;  %v948_v38 = vld [vmem:[%s2060_s1 + $0x100] sm:$0xff] }
  0x1d   : > { %1433 = vmatpush3.bf16.msra.mxu1 %v1430_v36  ;;  %v999_v35 = vld [vmem:[%s2060_s1 + $0x278] sm:$0xff]  ;;  %v1470_v36 = vpack.c.bf16 %v187_v33, %v186_v32  ;;  %v949_v39 = vld [vmem:[%s2060_s1 + $0x108] sm:$0xff]  ;;  %v1002_v40 = vld [vmem:[%s2060_s1 + $0x280] sm:$0xff] }
  0x1e   : > { %1529 = vmatpush3.bf16.msra.mxu0 %v1526_v37  ;;  %1435 = vmatprep.subr.bf16.mxu1 %v1434_v42  ;;  %v1566_v37 = vpack.c.bf16 %v999_v35, %v998_v34  ;;  %v1003_v41 = vld [vmem:[%s2060_s1 + $0x288] sm:$0xff]  ;;  %v950_v44 = vld [vmem:[%s2060_s1 + $0x110] sm:$0xff]  ;;  %v951_v45 = vld [vmem:[%s2060_s1 + $0x118] sm:$0xff] }
  0x1f   : > { %1531 = vmatprep.subr.bf16.mxu0 %v1530_v43  ;;  %v1004_v46 = vld [vmem:[%s2060_s1 + $0x290] sm:$0xff]  ;;  %v1005_v47 = vld [vmem:[%s2060_s1 + $0x298] sm:$0xff]  ;;  %v1478_v50 = vpack.c.bf16 %v951_v45, %v950_v44  ;;  %v952_v52 = vld [vmem:[%s2060_s1 + $0x120] sm:$0xff] }
  0x20   : > { %v1574_v51 = vpack.c.bf16 %v1005_v47, %v1004_v46  ;;  %v953_v53 = vld [vmem:[%s2060_s1 + $0x128] sm:$0xff]  ;;  %v956_v2 = vld [vmem:[%s2060_s1 + $0x140] sm:$0xff]  ;;  %v958_v8 = vld [vmem:[%s2060_s1 + $0x150] sm:$0xff] }
  0x21   : > { %1437 = vmatpush3.bf16.msra.mxu1 %v1434_v42  ;;  %v1474_v42 = vpack.c.bf16 %v949_v39, %v948_v38  ;;  %v946_v56 = vld [vmem:[%s1745_s24 + $0x2] ss:$2 sm:$0xff]  ;;  %v1482_v58 = vpack.c.bf16 %v953_v53, %v952_v52  ;;  %v959_v9 = vld [vmem:[%s2060_s1 + $0x158] sm:$0xff] }
  0x22   : > { %1533 = vmatpush3.bf16.msra.mxu0 %v1530_v43  ;;  %1439 = vmatprep.subr.bf16.mxu1 %v1438_v48  ;;  %v1570_v43 = vpack.c.bf16 %v1003_v41, %v1002_v40  ;;  %v957_v3 = vld [vmem:[%s2060_s1 + $0x148] sm:$0xff]  ;;  %v1012_v10 = vld [vmem:[%s2060_s1 + $0x2d0] sm:$0xff]  ;;  %v1013_v11 = vld [vmem:[%s2060_s1 + $0x2d8] sm:$0xff] }
  0x23   : > { %1535 = vmatprep.subr.bf16.mxu0 %v1534_v49  ;;  %v960_v14 = vld [vmem:[%s2060_s1 + $0x160] sm:$0xff]  ;;  %v961_v15 = vld [vmem:[%s2060_s1 + $0x168] sm:$0xff]  ;;  %v962_v20 = vld [vmem:[%s2060_s1 + $0x170] sm:$0xff] }
  0x24   : > { %v1014_v16 = vld [vmem:[%s2060_s1 + $0x2e0] sm:$0xff]  ;;  %v1015_v17 = vld [vmem:[%s2060_s1 + $0x2e8] sm:$0xff]  ;;  %v963_v21 = vld [vmem:[%s2060_s1 + $0x178] sm:$0xff] }
  0x25   : > { %1441 = vmatpush3.bf16.msra.mxu1 %v1438_v48  ;;  %v927_v48 = vld [vmem:[%s1745_s24 + $0x10] ss:$2 sm:$0xff]  ;;  %v1020_v26 = vld [vmem:[%s2060_s1 + $0x300] sm:$0xff]  ;;  %v1021_v27 = vld [vmem:[%s2060_s1 + $0x308] sm:$0xff] }
  0x26   : > { %1537 = vmatpush3.bf16.msra.mxu0 %v1534_v49  ;;  %1443 = vmatprep.subr.bf16.mxu1 %v1442_v54  ;;  %v983_v49 = vld [vmem:[%s1745_s24 + $0x14] ss:$2 sm:$0xff]  ;;  %v1602_v28 = vpack.c.bf16 %v1021_v27, %v1020_v26  ;;  %v1001_v32 = vld [vmem:[%s1745_s24 + $0x15] ss:$2 sm:$0xff] }
  0x27   : > { %1539 = vmatprep.subr.bf16.mxu0 %v1538_v55  ;;  %v1016_v22 = vld [vmem:[%s2060_s1 + $0x2f0] sm:$0xff]  ;;  %v1017_v23 = vld [vmem:[%s2060_s1 + $0x2f8] sm:$0xff]  ;;  %v1024_v35 = vld [vmem:[%s2060_s1 + $0x320] sm:$0xff] }
  0x28   : > { %1198 = vmatmul.mubr.f32.vlgmr.msra.gmra.mrb[0].mxu1 %v929_v60  ;;  %v954_v60 = vld [vmem:[%s2060_s1 + $0x130] sm:$0xff]  ;;  %v1027_v39 = vld [vmem:[%s2060_s1 + $0x338] sm:$0xff]  ;;  %v1028_v41 = vld [vmem:[%s2060_s1 + $0x340] sm:$0xff] }
  0x29   : > { %1445 = vmatpush3.bf16.msra.mxu1 %v1442_v54  ;;  %1303 = vmatmul.mubr.f32.vlgmr.msra.gmra.mrb[0].mxu0 %v965_v61  ;;  %v1006_v54 = vld [vmem:[%s2060_s1 + $0x2a0] sm:$0xff]  ;;  %v955_v61 = vld [vmem:[%s2060_s1 + $0x138] sm:$0xff]  ;;  %v1022_v29 = vld [vmem:[%s2060_s1 + $0x310] sm:$0xff] }
  0x2a   : > { %1541 = vmatpush3.bf16.msra.mxu0 %v1538_v55  ;;  %1447 = vmatprep.subr.bf16.mxu1 %v1446_v62  ;;  %v1007_v55 = vld [vmem:[%s2060_s1 + $0x2a8] sm:$0xff]  ;;  %v1486_v0 = vpack.c.bf16 %v955_v61, %v954_v60  ;;  %v1026_v38 = vld [vmem:[%s2060_s1 + $0x330] sm:$0xff]  ;;  %v1031_v45 = vld [vmem:[%s2060_s1 + $0x358] sm:$0xff] }
  0x2b   : > { %1543 = vmatprep.subr.bf16.mxu0 %v1542_v63  ;;  %1232 = vmatprep.mubr.f32.mxu1 %v169_v4  ;;  %v1578_v59 = vpack.c.bf16 %v1007_v55, %v1006_v54  ;;  %v1010_v4 = vld [vmem:[%s2060_s1 + $0x2c0] sm:$0xff]  ;;  %v1614_v40 = vpack.c.bf16 %v1027_v39, %v1026_v38  ;;  %v1030_v44 = vld [vmem:[%s2060_s1 + $0x350] sm:$0xff] }
  0x2c   : > { %1337 = vmatprep.mubr.f32.mxu0 %v982_v5  ;;  %v1011_v5 = vld [vmem:[%s2060_s1 + $0x2c8] sm:$0xff]  ;;  %v1622_v46 = vpack.c.bf16 %v1031_v45, %v1030_v44  ;;  %v1032_v47 = vld [vmem:[%s2060_s1 + $0x360] sm:$0xff] }
  0x2d   : > { %1449 = vmatpush3.bf16.msra.mxu1 %v1446_v62  ;;  %v1008_v62 = vld [vmem:[%s2060_s1 + $0x2b0] sm:$0xff] }
  0x2e   : > { %1545 = vmatpush3.bf16.msra.mxu0 %v1542_v63  ;;  %1451 = vmatprep.subr.bf16.mxu1 %v1450_v6  ;;  %v1009_v63 = vld [vmem:[%s2060_s1 + $0x2b8] sm:$0xff]  ;;  %v1018_v34 = vld [vmem:[%s1745_s24 + $0x6] ss:$2 sm:$0xff] }
  0x2f   : > { %1547 = vmatprep.subr.bf16.mxu0 %v1546_v7  ;;  %v1582_v1 = vpack.c.bf16 %v1009_v63, %v1008_v62  ;;  %v1019_v53 = vld [vmem:[%s1745_s24 + $0x16] ss:$2 sm:$0xff] }
  0x31   : > { %1453 = vmatpush3.bf16.msra.mxu1 %v1450_v6  ;;  %v1490_v6 = vpack.c.bf16 %v957_v3, %v956_v2 }
  0x32   : > { %1549 = vmatpush3.bf16.msra.mxu0 %v1546_v7  ;;  %1455 = vmatprep.subr.bf16.mxu1 %v1454_v12  ;;  %v1586_v7 = vpack.c.bf16 %v1011_v5, %v1010_v4 }
  0x33   : > { %1551 = vmatprep.subr.bf16.mxu0 %v1550_v13 }
  0x35   : > { %1457 = vmatpush3.bf16.msra.mxu1 %v1454_v12  ;;  %v1494_v12 = vpack.c.bf16 %v959_v9, %v958_v8 }
  0x36   : > { %1553 = vmatpush3.bf16.msra.mxu0 %v1550_v13  ;;  %1459 = vmatprep.subr.bf16.mxu1 %v1458_v18  ;;  %v1590_v13 = vpack.c.bf16 %v1013_v11, %v1012_v10 }
  0x37   : > { %1555 = vmatprep.subr.bf16.mxu0 %v1554_v19 }
  0x39   : > { %1461 = vmatpush3.bf16.msra.mxu1 %v1458_v18  ;;  %v1498_v18 = vpack.c.bf16 %v961_v15, %v960_v14 }
  0x3a   : > { %1557 = vmatpush3.bf16.msra.mxu0 %v1554_v19  ;;  %1463 = vmatprep.subr.bf16.mxu1 %v1462_v24  ;;  %v1594_v19 = vpack.c.bf16 %v1015_v17, %v1014_v16 }
  0x3b   : > { %1559 = vmatprep.subr.bf16.mxu0 %v1558_v25 }
  0x3d   : > { %1465 = vmatpush3.bf16.msra.mxu1 %v1462_v24  ;;  %v1502_v24 = vpack.c.bf16 %v963_v21, %v962_v20 }
  0x3e   : > { %1561 = vmatpush3.bf16.msra.mxu0 %v1558_v25  ;;  %1467 = vmatprep.subr.bf16.mxu1 %v1466_v30  ;;  %v1598_v25 = vpack.c.bf16 %v1017_v23, %v1016_v22 }
  0x3f   : > { %1563 = vmatprep.subr.bf16.mxu0 %v1562_v31 }
  0x41   : > { %1469 = vmatpush3.bf16.msra.mxu1 %v1466_v30  ;;  %v1023_v30 = vld [vmem:[%s2060_s1 + $0x318] sm:$0xff] }
  0x42   : > { %1565 = vmatpush3.bf16.msra.mxu0 %v1562_v31  ;;  %1471 = vmatprep.subr.bf16.mxu1 %v1470_v36  ;;  %v947_v31 = vld [vmem:[%s1745_s24 + $0x12] ss:$2 sm:$0xff]  ;;  %v1606_v33 = vpack.c.bf16 %v1023_v30, %v1022_v29 }
  0x43   : > { %1567 = vmatprep.subr.bf16.mxu0 %v1566_v37 }
  0x45   : > { %1473 = vmatpush3.bf16.msra.mxu1 %v1470_v36  ;;  %v1025_v36 = vld [vmem:[%s2060_s1 + $0x328] sm:$0xff] }
  0x46   : > { %1569 = vmatpush3.bf16.msra.mxu0 %v1566_v37  ;;  %1475 = vmatprep.subr.bf16.mxu1 %v1474_v42  ;;  %v1610_v37 = vpack.c.bf16 %v1025_v36, %v1024_v35 }
  0x47   : > { %1571 = vmatprep.subr.bf16.mxu0 %v1570_v43 }
  0x48   : > { %1233 = vmatmul.mubr.f32.vlgmr.msra.gmra.mrb[0].mxu1 %v927_v48  ;;  %v1033_v48 = vld [vmem:[%s2060_s1 + $0x368] sm:$0xff] }
  0x49   : > { %1477 = vmatpush3.bf16.msra.mxu1 %v1474_v42  ;;  %1338 = vmatmul.mubr.f32.vlgmr.msra.gmra.mrb[0].mxu0 %v983_v49  ;;  %v1029_v42 = vld [vmem:[%s2060_s1 + $0x348] sm:$0xff]  ;;  %v1626_v49 = vpack.c.bf16 %v1033_v48, %v1032_v47 }
  0x4a   : > { %1573 = vmatpush3.bf16.msra.mxu0 %v1570_v43  ;;  %1479 = vmatprep.subr.bf16.mxu1 %v1478_v50  ;;  %v1618_v43 = vpack.c.bf16 %v1029_v42, %v1028_v41 }
  0x4b   : > { %1575 = vmatprep.subr.bf16.mxu0 %v1574_v51  ;;  %1267 = vmatprep.mubr.f32.mxu1 %v946_v56 }
  0x4c   : > { %1372 = vmatprep.mubr.f32.mxu0 %v1000_v57  ;;  %v1036_v57 = vld [vmem:[%s2061_s2] ss:$0 sm:$0xff] }
  0x4d   : > { %1481 = vmatpush3.bf16.msra.mxu1 %v1478_v50  ;;  %v1034_v50 = vld [vmem:[%s2060_s1 + $0x370] sm:$0xff] }
  0x4e   : > { %1577 = vmatpush3.bf16.msra.mxu0 %v1574_v51  ;;  %1483 = vmatprep.subr.bf16.mxu1 %v1482_v58  ;;  %v1035_v51 = vld [vmem:[%s2060_s1 + $0x378] sm:$0xff] }
  0x4f   : > { %1579 = vmatprep.subr.bf16.mxu0 %v1578_v59  ;;  %v1630_v52 = vpack.c.bf16 %v1035_v51, %v1034_v50 }
  0x51   : > { %1485 = vmatpush3.bf16.msra.mxu1 %v1482_v58 }
  0x52   : > { %1581 = vmatpush3.bf16.msra.mxu0 %v1578_v59  ;;  %1487 = vmatprep.subr.bf16.mxu1 %v1486_v0 }
  0x53   : > { %1583 = vmatprep.subr.bf16.mxu0 %v1582_v1 }
  0x55   : > { %1489 = vmatpush3.bf16.msra.mxu1 %v1486_v0 }
  0x56   : > { %1585 = vmatpush3.bf16.msra.mxu0 %v1582_v1  ;;  %1491 = vmatprep.subr.bf16.mxu1 %v1490_v6 }
  0x57   : > { %1587 = vmatprep.subr.bf16.mxu0 %v1586_v7 }
  0x59   : > { %1493 = vmatpush3.bf16.msra.mxu1 %v1490_v6 }
  0x5a   : > { %1589 = vmatpush3.bf16.msra.mxu0 %v1586_v7  ;;  %1495 = vmatprep.subr.bf16.mxu1 %v1494_v12 }
  0x5b   : > { %1591 = vmatprep.subr.bf16.mxu0 %v1590_v13 }
  0x5d   : > { %1497 = vmatpush3.bf16.msra.mxu1 %v1494_v12 }
  0x5e   : > { %1593 = vmatpush3.bf16.msra.mxu0 %v1590_v13  ;;  %1499 = vmatprep.subr.bf16.mxu1 %v1498_v18 }
  0x5f   : > { %1595 = vmatprep.subr.bf16.mxu0 %v1594_v19 }
  0x61   : > { %1501 = vmatpush3.bf16.msra.mxu1 %v1498_v18 }
  0x62   : > { %1597 = vmatpush3.bf16.msra.mxu0 %v1594_v19  ;;  %1503 = vmatprep.subr.bf16.mxu1 %v1502_v24 }
  0x63   : > { %1599 = vmatprep.subr.bf16.mxu0 %v1598_v25 }
  0x65   : > { %1505 = vmatpush3.bf16.msra.mxu1 %v1502_v24 }
  0x66   : > { %1601 = vmatpush3.bf16.msra.mxu0 %v1598_v25 }
  0x67   : > { %1603 = vmatprep.subr.bf16.mxu0 %v1602_v28 }
  0x68   : > { %1268 = vmatmul.mubr.f32.vlgmr.msra.gmra.mrb[0].mxu1 %v947_v31 }
  0x69   : > { %1373 = vmatmul.mubr.f32.vlgmr.msra.gmra.mrb[0].mxu0 %v1001_v32 }
  0x6a   : > { %1605 = vmatpush3.bf16.msra.mxu0 %v1602_v28  ;;  %1407 = vmatprep.mubr.f32.mxu0 %v1018_v34 }
  0x6b   : > { %1607 = vmatprep.subr.bf16.mxu0 %v1606_v33 }
  0x6e   : > { %1609 = vmatpush3.bf16.msra.mxu0 %v1606_v33 }
  0x6f   : > { %1611 = vmatprep.subr.bf16.mxu0 %v1610_v37 }
  0x72   : > { %1613 = vmatpush3.bf16.msra.mxu0 %v1610_v37 }
  0x73   : > { %1615 = vmatprep.subr.bf16.mxu0 %v1614_v40 }
  0x76   : > { %1617 = vmatpush3.bf16.msra.mxu0 %v1614_v40 }
  0x77   : > { %1619 = vmatprep.subr.bf16.mxu0 %v1618_v43 }
  0x7a   : > { %1621 = vmatpush3.bf16.msra.mxu0 %v1618_v43 }
  0x7b   : > { %1623 = vmatprep.subr.bf16.mxu0 %v1622_v46 }
  0x7e   : > { %1625 = vmatpush3.bf16.msra.mxu0 %v1622_v46 }
  0x7f   : > { %1627 = vmatprep.subr.bf16.mxu0 %v1626_v49 }
  0x82   : > { %1629 = vmatpush3.bf16.msra.mxu0 %v1626_v49 }
  0x83   : > { %1631 = vmatprep.subr.bf16.mxu0 %v1630_v52 }
  0x86   : > { %1633 = vmatpush3.bf16.msra.mxu0 %v1630_v52 }
  0x89   : > { %1408 = vmatmul.mubr.f32.vlgmr.msra.gmra.mrb[0].mxu0 %v1019_v53 }
 0x13b   : > { %v1269_v54 = vpop.f32.mrb[0].mxu1 }
 0x13c   : > { %v446_v55 = vpop.f32.mrb[1].mxu1 }
 0x15c   : > { %v1409_v56 = vpop.f32.mrb[0].mxu0 }
 0x15d   : > { %v1634_v58 = vadd.f32 %v1409_v56, %v1269_v54  ;;  %v838_v59 = vpop.f32.mrb[1].mxu0 }
 0x15e   : > { %v1635_v60 = vadd.f32 %v838_v59, %v446_v55 }
 0x15f   : > { %v857_v61 = vadd.f32 %v1634_v58, %v1036_v57 }
 0x160   : > { %v856_v62 = vadd.f32 %v1635_v60, %v1036_v57 }
 0x161   : > { %v859_v63 = vmax.f32 %v857_v61, 0.0 }
 0x162   : > { %v858_v0 = vmax.f32 %v856_v62, 0.0 }
 0x163   : > { %861 = vst [vmem:[#allocation2 + $0x8] sm:$0xff] %v859_v63 }
 0x164   : > { %860 = vst [vmem:[#allocation2] sm:$0xff] %v858_v0 }
 0x16b   : > { %v862_v1 = vld [vmem:[#allocation2] ss:$2 sm:$0xff]  ;;  %v864_v2 = vld [vmem:[#allocation2 + $0x1] ss:$2 sm:$0xff] }
 0x16c   : > { %v865_v3 = vmax.f32 %v862_v1, %v864_v2 }
 0x16e   : > { %866 = vst [vmem:[%s168_s29] sm:$0xff] %v865_v3 }
 0x16f PF: > { %s13_s12 = sadd.s32 1, %s1661_s12  }
 0x170   : > { %p10_p4 = scmp.ge.s32.totalorder %s13_s12, 4  }
 0x172   :  { %12 = sbr.rel (!%p10_p4) target bundleno = 1 (0x1), region = 82 }

// kernel: _lambda_.6
= control target key start
LH: loop header
LB: loop body
LE: loop exit
PB: predicated region body
PF: predicated region fallthrough
CT: control target
= control target key end

     0   :  { %s1551_s12 = smov 0   ;;  %s1994_s0 = inlined_call_operand.vmem [shape: f32[2,14,128], index: 0, kind: input, shape index: {}]   ;;  %s1995_s1 = inlined_call_operand.vmem [shape: f32[7,128,128], index: 1, kind: input, shape index: {}]   ;;  %s1996_s2 = inlined_call_operand.vmem [shape: f32[1,128], index: 2, kind: input, shape index: {}]   ;;  %s1997_s3 = inlined_call_operand.vmem [shape: f32[2,2,128], index: 3, kind: output, shape index: {}]  }
   0x1 LB: > { %s863_s13 = sadd.s32 4294967295, %s1526_s12   ;;  %p867_p0 = scmp.ge.s32.totalorder %s1526_s12, 1  ;;  %s1526_s12 = sphi %s1551_s12, %s13_s12  }
   0x2   : > { %p137_p1 = scmp.lt.s32.totalorder %s1526_s12, 3 }
   0x4   : > { %p138_p2 = pnand %p867_p0, %p137_p1 }
   0x5   : > { %v872_v0 = vld [vmem:[%s1995_s1 + $0x80] sm:$0xff] (!%p138_p2)  ;;  %v873_v1 = vld [vmem:[%s1995_s1 + $0x88] sm:$0xff] (!%p138_p2)  ;;  %v1528_v3 = vmov (!%p138_p2), 0.0|0.0   ;;  %v874_v6 = vld [vmem:[%s1995_s1 + $0x90] sm:$0xff] (!%p138_p2)  ;;  %vm1529_vm0 = vmmov (!%p138_p2), 0   ;;  %v1530_v11 = vmov (!%p138_p2), 0.0  }
   0x6   : > { %141 = sbr.rel (%p138_p2) target bundleno = 364 (0x16c), region = 32  ;;  %v170_v2 = vld [vmem:[%s1995_s1] sm:$0xff] (!%p138_p2)  ;;  %1341 = vmatprep.subr.bf16.mxu0 (!%p138_p2), %v1528_v3  ;;  %v1342_v4 = vpack.c.bf16 (!%p138_p2), %v873_v1, %v872_v0  ;;  %1365 = vmatprep.subr.bf16.mxu1 (!%p138_p2), %v1528_v3  ;;  %v171_v5 = vld [vmem:[%s1995_s1 + $0x8] sm:$0xff] (!%p138_p2)  ;;  %v875_v7 = vld [vmem:[%s1995_s1 + $0x98] sm:$0xff] (!%p138_p2)  ;;  %p160_p3 = scmp.lt.s32.totalorder (!%p138_p2), %s863_s13, 1 }
   0x7   : > { %v1366_v8 = vpack.c.bf16 (!%p138_p2), %v171_v5, %v170_v2  ;;  %v172_v9 = vld [vmem:[%s1995_s1 + $0x10] sm:$0xff] (!%p138_p2)  ;;  %v173_v10 = vld [vmem:[%s1995_s1 + $0x18] sm:$0xff] (!%p138_p2)  ;;  %1128 = vmatprep.mubr.msk.f32.mxu0 (!%p138_p2), %vm1529_vm0, %v1530_v11  ;;  %1163 = vmatprep.mubr.msk.f32.mxu1 (!%p138_p2), %vm1529_vm0, %v1530_v11  ;;  %v1345_v12 = vpack.c.bf16 (!%p138_p2), %v875_v7, %v874_v6  ;;  %v876_v14 = vld [vmem:[%s1995_s1 + $0xa0] sm:$0xff] (!%p138_p2) }
   0x8   : > { %1343 = vmatpush3.bf16.msra.mxu0 (!%p138_p2), %v1342_v4  ;;  %v1369_v13 = vpack.c.bf16 (!%p138_p2), %v173_v10, %v172_v9  ;;  %v877_v15 = vld [vmem:[%s1995_s1 + $0xa8] sm:$0xff] (!%p138_p2)  ;;  %v174_v16 = vld [vmem:[%s1995_s1 + $0x20] sm:$0xff] (!%p138_p2)  ;;  %v878_v20 = vld [vmem:[%s1995_s1 + $0xb0] sm:$0xff] (!%p138_p2) }
   0x9   : > { %1367 = vmatpush3.bf16.msra.mxu1 (!%p138_p2), %v1366_v8  ;;  %1344 = vmatprep.subr.bf16.mxu0 (!%p138_p2), %v1528_v3  ;;  %v175_v17 = vld [vmem:[%s1995_s1 + $0x28] sm:$0xff] (!%p138_p2)  ;;  %v1348_v18 = vpack.c.bf16 (!%p138_p2), %v877_v15, %v876_v14  ;;  %v879_v21 = vld [vmem:[%s1995_s1 + $0xb8] sm:$0xff] (!%p138_p2)  ;;  %v176_v22 = vld [vmem:[%s1995_s1 + $0x30] sm:$0xff] (!%p138_p2) }
   0xa   : > { %1368 = vmatprep.subr.bf16.mxu1 (!%p138_p2), %v1528_v3  ;;  %v1372_v19 = vpack.c.bf16 (!%p138_p2), %v175_v17, %v174_v16  ;;  %v177_v23 = vld [vmem:[%s1995_s1 + $0x38] sm:$0xff] (!%p138_p2)  ;;  %v1351_v24 = vpack.c.bf16 (!%p138_p2), %v879_v21, %v878_v20  ;;  %v880_v26 = vld [vmem:[%s1995_s1 + $0xc0] sm:$0xff] (!%p138_p2)  ;;  %v881_v27 = vld [vmem:[%s1995_s1 + $0xc8] sm:$0xff] (!%p138_p2) }
   0xb   : > { %v1375_v25 = vpack.c.bf16 (!%p138_p2), %v177_v23, %v176_v22  ;;  %v178_v28 = vld [vmem:[%s1995_s1 + $0x40] sm:$0xff] (!%p138_p2)  ;;  %v179_v29 = vld [vmem:[%s1995_s1 + $0x48] sm:$0xff] (!%p138_p2)  ;;  %v1354_v30 = vpack.c.bf16 (!%p138_p2), %v881_v27, %v880_v26  ;;  %v882_v32 = vld [vmem:[%s1995_s1 + $0xd0] sm:$0xff] (!%p138_p2) }
   0xc   : > { %1346 = vmatpush3.bf16.msra.mxu0 (!%p138_p2), %v1345_v12  ;;  %v1378_v31 = vpack.c.bf16 (!%p138_p2), %v179_v29, %v178_v28  ;;  %v883_v33 = vld [vmem:[%s1995_s1 + $0xd8] sm:$0xff] (!%p138_p2)  ;;  %v180_v34 = vld [vmem:[%s1995_s1 + $0x50] sm:$0xff] (!%p138_p2)  ;;  %v884_v38 = vld [vmem:[%s1995_s1 + $0xe0] sm:$0xff] (!%p138_p2) }
   0xd   : > { %1370 = vmatpush3.bf16.msra.mxu1 %v1369_v13  ;;  %1347 = vmatprep.subr.bf16.mxu0 %v1528_v3  ;;  %v181_v35 = vld [vmem:[%s1995_s1 + $0x58] sm:$0xff]  ;;  %v1357_v36 = vpack.c.bf16 %v883_v33, %v882_v32  ;;  %v885_v39 = vld [vmem:[%s1995_s1 + $0xe8] sm:$0xff]  ;;  %v182_v40 = vld [vmem:[%s1995_s1 + $0x60] sm:$0xff]  ;;  %s1999_s13 = smov (!%p160_p3, %s863_s13), 1 }
   0xe   : > { %1371 = vmatprep.subr.bf16.mxu1 %v1528_v3  ;;  %v1381_v37 = vpack.c.bf16 %v181_v35, %v180_v34  ;;  %v183_v41 = vld [vmem:[%s1995_s1 + $0x68] sm:$0xff]  ;;  %v1360_v42 = vpack.c.bf16 %v885_v39, %v884_v38  ;;  %v886_v44 = vld [vmem:[%s1995_s1 + $0xf0] sm:$0xff]  ;;  %v887_v45 = vld [vmem:[%s1995_s1 + $0xf8] sm:$0xff]  ;;  %s976_s28 = sshll.u32 %s1999_s13, 4  ;;  %s870_s24 = sshll.u32 %s1999_s13, 1 }
   0xf   : > { %v1384_v43 = vpack.c.bf16 %v183_v41, %v182_v40  ;;  %v184_v46 = vld [vmem:[%s1995_s1 + $0x70] sm:$0xff]  ;;  %v185_v47 = vld [vmem:[%s1995_s1 + $0x78] sm:$0xff]  ;;  %v1363_v48 = vpack.c.bf16 %v887_v45, %v886_v44  ;;  %s1684_s4 = scalar_lea.vmem %s1994_s0, %s976_s28  ;;  %v889_v50 = vld [vmem:[%s1995_s1 + $0x100] sm:$0xff]  ;;  %s168_s27 = scalar_lea.vmem %s1997_s3, %s870_s24 }
  0x10   : > { %1349 = vmatpush3.bf16.msra.mxu0 %v1348_v18  ;;  %v1387_v49 = vpack.c.bf16 %v185_v47, %v184_v46  ;;  %v890_v51 = vld [vmem:[%s1995_s1 + $0x108] sm:$0xff]  ;;  %v906_v52 = vld [vmem:[%s1995_s1 + $0x180] sm:$0xff]  ;;  %v891_v58 = vld [vmem:[%s1995_s1 + $0x110] sm:$0xff] }
  0x11   : > { %1373 = vmatpush3.bf16.msra.mxu1 %v1372_v19  ;;  %1350 = vmatprep.subr.bf16.mxu0 %v1528_v3  ;;  %v907_v53 = vld [vmem:[%s1995_s1 + $0x188] sm:$0xff]  ;;  %v871_v54 = vld [vmem:[%s1684_s4 + $0x1] ss:$2 sm:$0xf]  ;;  %v1390_v55 = vpack.c.bf16 %v890_v51, %v889_v50  ;;  %v892_v59 = vld [vmem:[%s1995_s1 + $0x118] sm:$0xff] }
  0x12   : > { %1374 = vmatprep.subr.bf16.mxu1 %v1528_v3  ;;  %v169_v56 = vld [vmem:[%s1684_s4] ss:$2 sm:$0xf]  ;;  %v1414_v57 = vpack.c.bf16 %v907_v53, %v906_v52  ;;  %v908_v60 = vld [vmem:[%s1995_s1 + $0x190] sm:$0xff]  ;;  %v909_v61 = vld [vmem:[%s1995_s1 + $0x198] sm:$0xff]  ;;  %v1393_v62 = vpack.c.bf16 %v892_v59, %v891_v58 }
  0x13   : > { %v1417_v63 = vpack.c.bf16 %v909_v61, %v908_v60  ;;  %v893_v0 = vld [vmem:[%s1995_s1 + $0x120] sm:$0xff]  ;;  %v894_v1 = vld [vmem:[%s1995_s1 + $0x128] sm:$0xff]  ;;  %v895_v7 = vld [vmem:[%s1995_s1 + $0x130] sm:$0xff] }
  0x14   : > { %1352 = vmatpush3.bf16.msra.mxu0 %v1351_v24  ;;  %v910_v2 = vld [vmem:[%s1995_s1 + $0x1a0] sm:$0xff]  ;;  %v911_v4 = vld [vmem:[%s1995_s1 + $0x1a8] sm:$0xff]  ;;  %v1396_v5 = vpack.c.bf16 %v894_v1, %v893_v0  ;;  %v896_v8 = vld [vmem:[%s1995_s1 + $0x138] sm:$0xff] }
  0x15   : > { %1376 = vmatpush3.bf16.msra.mxu1 %v1375_v25  ;;  %1353 = vmatprep.subr.bf16.mxu0 %v1528_v3  ;;  %v1420_v6 = vpack.c.bf16 %v911_v4, %v910_v2  ;;  %v912_v9 = vld [vmem:[%s1995_s1 + $0x1b0] sm:$0xff]  ;;  %v913_v10 = vld [vmem:[%s1995_s1 + $0x1b8] sm:$0xff]  ;;  %v1399_v12 = vpack.c.bf16 %v896_v8, %v895_v7  ;;  %v897_v14 = vld [vmem:[%s1995_s1 + $0x140] sm:$0xff] }
  0x16   : > { %1377 = vmatprep.subr.bf16.mxu1 %v1528_v3  ;;  %v1423_v13 = vpack.c.bf16 %v913_v10, %v912_v9  ;;  %v898_v15 = vld [vmem:[%s1995_s1 + $0x148] sm:$0xff]  ;;  %v914_v16 = vld [vmem:[%s1995_s1 + $0x1c0] sm:$0xff]  ;;  %v899_v20 = vld [vmem:[%s1995_s1 + $0x150] sm:$0xff] }
  0x17   : > { %v915_v17 = vld [vmem:[%s1995_s1 + $0x1c8] sm:$0xff]  ;;  %v1402_v18 = vpack.c.bf16 %v898_v15, %v897_v14  ;;  %v900_v21 = vld [vmem:[%s1995_s1 + $0x158] sm:$0xff]  ;;  %v916_v22 = vld [vmem:[%s1995_s1 + $0x1d0] sm:$0xff] }
  0x18   : > { %1355 = vmatpush3.bf16.msra.mxu0 %v1354_v30  ;;  %v1426_v19 = vpack.c.bf16 %v915_v17, %v914_v16  ;;  %v917_v23 = vld [vmem:[%s1995_s1 + $0x1d8] sm:$0xff]  ;;  %v1405_v24 = vpack.c.bf16 %v900_v21, %v899_v20  ;;  %v901_v26 = vld [vmem:[%s1995_s1 + $0x160] sm:$0xff]  ;;  %v902_v27 = vld [vmem:[%s1995_s1 + $0x168] sm:$0xff] }
  0x19   : > { %1379 = vmatpush3.bf16.msra.mxu1 %v1378_v31  ;;  %1356 = vmatprep.subr.bf16.mxu0 %v1528_v3  ;;  %v1429_v25 = vpack.c.bf16 %v917_v23, %v916_v22  ;;  %v918_v28 = vld [vmem:[%s1995_s1 + $0x1e0] sm:$0xff]  ;;  %v919_v29 = vld [vmem:[%s1995_s1 + $0x1e8] sm:$0xff]  ;;  %v1408_v30 = vpack.c.bf16 %v902_v27, %v901_v26  ;;  %v903_v32 = vld [vmem:[%s1995_s1 + $0x170] sm:$0xff] }
  0x1a   : > { %1380 = vmatprep.subr.bf16.mxu1 %v1528_v3  ;;  %v1432_v31 = vpack.c.bf16 %v919_v29, %v918_v28  ;;  %v904_v33 = vld [vmem:[%s1995_s1 + $0x178] sm:$0xff]  ;;  %v920_v34 = vld [vmem:[%s1995_s1 + $0x1f0] sm:$0xff]  ;;  %v923_v38 = vld [vmem:[%s1995_s1 + $0x200] sm:$0xff] }
  0x1b   : > { %v921_v35 = vld [vmem:[%s1995_s1 + $0x1f8] sm:$0xff]  ;;  %v924_v39 = vld [vmem:[%s1995_s1 + $0x208] sm:$0xff]  ;;  %v940_v40 = vld [vmem:[%s1995_s1 + $0x280] sm:$0xff] }
  0x1c   : > { %1358 = vmatpush3.bf16.msra.mxu0 %v1357_v36  ;;  %v1411_v36 = vpack.c.bf16 %v904_v33, %v903_v32  ;;  %v941_v41 = vld [vmem:[%s1995_s1 + $0x288] sm:$0xff]  ;;  %v925_v46 = vld [vmem:[%s1995_s1 + $0x210] sm:$0xff]  ;;  %v926_v47 = vld [vmem:[%s1995_s1 + $0x218] sm:$0xff] }
  0x1d   : > { %1382 = vmatpush3.bf16.msra.mxu1 %v1381_v37  ;;  %1359 = vmatprep.subr.bf16.mxu0 %v1528_v3  ;;  %v1435_v37 = vpack.c.bf16 %v921_v35, %v920_v34  ;;  %v905_v44 = vld [vmem:[%s1684_s4 + $0x3] ss:$2 sm:$0xf]  ;;  %v1462_v45 = vpack.c.bf16 %v941_v41, %v940_v40  ;;  %v1441_v50 = vpack.c.bf16 %v926_v47, %v925_v46  ;;  %v929_v58 = vld [vmem:[%s1995_s1 + $0x230] sm:$0xff]  ;;  %v930_v59 = vld [vmem:[%s1995_s1 + $0x238] sm:$0xff] }
  0x1e   : > { %1383 = vmatprep.subr.bf16.mxu1 %v1528_v3  ;;  %v927_v52 = vld [vmem:[%s1995_s1 + $0x220] sm:$0xff]  ;;  %v928_v53 = vld [vmem:[%s1995_s1 + $0x228] sm:$0xff]  ;;  %v946_v60 = vld [vmem:[%s1995_s1 + $0x2b0] sm:$0xff] }
  0x1f   : > { %v947_v61 = vld [vmem:[%s1995_s1 + $0x2b8] sm:$0xff]  ;;  %v931_v0 = vld [vmem:[%s1995_s1 + $0x240] sm:$0xff]  ;;  %v932_v1 = vld [vmem:[%s1995_s1 + $0x248] sm:$0xff] }
  0x20   : > { %1361 = vmatpush3.bf16.msra.mxu0 %v1360_v42  ;;  %v888_v42 = vld [vmem:[%s1684_s4 + $0x2] ss:$2 sm:$0xf]  ;;  %v933_v7 = vld [vmem:[%s1995_s1 + $0x250] sm:$0xff]  ;;  %v934_v8 = vld [vmem:[%s1995_s1 + $0x258] sm:$0xff] }
  0x21   : > { %1385 = vmatpush3.bf16.msra.mxu1 %v1384_v43  ;;  %1362 = vmatprep.subr.bf16.mxu0 %v1528_v3  ;;  %v1438_v43 = vpack.c.bf16 %v924_v39, %v923_v38  ;;  %v948_v2 = vld [vmem:[%s1995_s1 + $0x2c0] sm:$0xff]  ;;  %v949_v4 = vld [vmem:[%s1995_s1 + $0x2c8] sm:$0xff]  ;;  %v950_v9 = vld [vmem:[%s1995_s1 + $0x2d0] sm:$0xff] }
  0x22   : > { %1386 = vmatprep.subr.bf16.mxu1 %v1528_v3  ;;  %v951_v10 = vld [vmem:[%s1995_s1 + $0x2d8] sm:$0xff]  ;;  %v935_v14 = vld [vmem:[%s1995_s1 + $0x260] sm:$0xff]  ;;  %v936_v15 = vld [vmem:[%s1995_s1 + $0x268] sm:$0xff] }
  0x23   : > { %v952_v16 = vld [vmem:[%s1995_s1 + $0x2e0] sm:$0xff]  ;;  %v953_v17 = vld [vmem:[%s1995_s1 + $0x2e8] sm:$0xff]  ;;  %v937_v20 = vld [vmem:[%s1995_s1 + $0x270] sm:$0xff] }
  0x24   : > { %1364 = vmatpush3.bf16.msra.mxu0 %v1363_v48  ;;  %v942_v48 = vld [vmem:[%s1995_s1 + $0x290] sm:$0xff]  ;;  %v938_v21 = vld [vmem:[%s1995_s1 + $0x278] sm:$0xff]  ;;  %v957_v26 = vld [vmem:[%s1995_s1 + $0x300] sm:$0xff] }
  0x25   : > { %1388 = vmatpush3.bf16.msra.mxu1 %v1387_v49  ;;  %1389 = vmatprep.subr.bf16.mxu0 %v1528_v3  ;;  %v943_v49 = vld [vmem:[%s1995_s1 + $0x298] sm:$0xff]  ;;  %v954_v22 = vld [vmem:[%s1995_s1 + $0x2f0] sm:$0xff]  ;;  %v958_v27 = vld [vmem:[%s1995_s1 + $0x308] sm:$0xff] }
  0x26   : > { %1413 = vmatprep.subr.bf16.mxu1 %v1528_v3  ;;  %v1465_v51 = vpack.c.bf16 %v943_v49, %v942_v48  ;;  %v955_v23 = vld [vmem:[%s1995_s1 + $0x2f8] sm:$0xff]  ;;  %v922_v28 = vld [vmem:[%s1684_s4 + $0x4] ss:$2 sm:$0xf]  ;;  %v1486_v29 = vpack.c.bf16 %v958_v27, %v957_v26  ;;  %v971_v48 = vld [vmem:[%s1995_s1 + $0x370] sm:$0xff] }
  0x27   : > { %1129 = vmatmul.mubr.f32.vlgmr.msra.gmra.mrb[0].mxu0 %v871_v54  ;;  %v944_v54 = vld [vmem:[%s1995_s1 + $0x2a0] sm:$0xff]  ;;  %v960_v32 = vld [vmem:[%s1995_s1 + $0x318] sm:$0xff]  ;;  %v962_v35 = vld [vmem:[%s1995_s1 + $0x328] sm:$0xff] }
  0x28   : > { %1164 = vmatmul.mubr.f32.vlgmr.msra.gmra.mrb[0].mxu1 %v169_v56  ;;  %1391 = vmatpush3.bf16.msra.mxu0 %v1390_v55  ;;  %v945_v55 = vld [vmem:[%s1995_s1 + $0x2a8] sm:$0xff]  ;;  %v1444_v56 = vpack.c.bf16 %v928_v53, %v927_v52  ;;  %v961_v34 = vld [vmem:[%s1995_s1 + $0x320] sm:$0xff]  ;;  %v964_v38 = vld [vmem:[%s1995_s1 + $0x338] sm:$0xff] }
  0x29   : > { %1415 = vmatpush3.bf16.msra.mxu1 %v1414_v57  ;;  %1392 = vmatprep.subr.bf16.mxu0 %v1528_v3  ;;  %v1468_v57 = vpack.c.bf16 %v945_v55, %v944_v54  ;;  %v966_v40 = vld [vmem:[%s1995_s1 + $0x348] sm:$0xff]  ;;  %v972_v49 = vld [vmem:[%s1995_s1 + $0x378] sm:$0xff] }
  0x2a   : > { %1416 = vmatprep.subr.bf16.mxu1 %v1528_v3  ;;  %1198 = vmatprep.mubr.msk.f32.mxu0 %vm1529_vm0, %v1530_v11  ;;  %v970_v46 = vld [vmem:[%s1995_s1 + $0x368] sm:$0xff] }
  0x2b   : > { %1233 = vmatprep.mubr.msk.f32.mxu1 %vm1529_vm0, %v1530_v11 }
  0x2c   : > { %1394 = vmatpush3.bf16.msra.mxu0 %v1393_v62  ;;  %v1447_v62 = vpack.c.bf16 %v930_v59, %v929_v58 }
  0x2d   : > { %1418 = vmatpush3.bf16.msra.mxu1 %v1417_v63  ;;  %1395 = vmatprep.subr.bf16.mxu0 %v1528_v3  ;;  %v1471_v63 = vpack.c.bf16 %v947_v61, %v946_v60 }
  0x2e   : > { %1419 = vmatprep.subr.bf16.mxu1 %v1528_v3 }
  0x30   : > { %1397 = vmatpush3.bf16.msra.mxu0 %v1396_v5  ;;  %v1450_v5 = vpack.c.bf16 %v932_v1, %v931_v0 }
  0x31   : > { %1421 = vmatpush3.bf16.msra.mxu1 %v1420_v6  ;;  %1398 = vmatprep.subr.bf16.mxu0 %v1528_v3  ;;  %v1474_v6 = vpack.c.bf16 %v949_v4, %v948_v2 }
  0x32   : > { %1422 = vmatprep.subr.bf16.mxu1 %v1528_v3 }
  0x34   : > { %1400 = vmatpush3.bf16.msra.mxu0 %v1399_v12  ;;  %v1453_v12 = vpack.c.bf16 %v934_v8, %v933_v7 }
  0x35   : > { %1424 = vmatpush3.bf16.msra.mxu1 %v1423_v13  ;;  %1401 = vmatprep.subr.bf16.mxu0 %v1528_v3  ;;  %v1477_v13 = vpack.c.bf16 %v951_v10, %v950_v9 }
  0x36   : > { %1425 = vmatprep.subr.bf16.mxu1 %v1528_v3 }
  0x38   : > { %1403 = vmatpush3.bf16.msra.mxu0 %v1402_v18  ;;  %v1456_v18 = vpack.c.bf16 %v936_v15, %v935_v14 }
  0x39   : > { %1427 = vmatpush3.bf16.msra.mxu1 %v1426_v19  ;;  %1404 = vmatprep.subr.bf16.mxu0 %v1528_v3  ;;  %v1480_v19 = vpack.c.bf16 %v953_v17, %v952_v16 }
  0x3a   : > { %1428 = vmatprep.subr.bf16.mxu1 %v1528_v3 }
  0x3c   : > { %1406 = vmatpush3.bf16.msra.mxu0 %v1405_v24  ;;  %v1459_v24 = vpack.c.bf16 %v938_v21, %v937_v20 }
  0x3d   : > { %1430 = vmatpush3.bf16.msra.mxu1 %v1429_v25  ;;  %1407 = vmatprep.subr.bf16.mxu0 %v1528_v3  ;;  %v1483_v25 = vpack.c.bf16 %v955_v23, %v954_v22 }
  0x3e   : > { %1431 = vmatprep.subr.bf16.mxu1 %v1528_v3 }
  0x40   : > { %1409 = vmatpush3.bf16.msra.mxu0 %v1408_v30  ;;  %v939_v30 = vld [vmem:[%s1684_s4 + $0x5] ss:$2 sm:$0xf] }
  0x41   : > { %1433 = vmatpush3.bf16.msra.mxu1 %v1432_v31  ;;  %1410 = vmatprep.subr.bf16.mxu0 %v1528_v3  ;;  %v959_v31 = vld [vmem:[%s1995_s1 + $0x310] sm:$0xff] }
  0x42   : > { %1434 = vmatprep.subr.bf16.mxu1 %v1528_v3  ;;  %v1489_v33 = vpack.c.bf16 %v960_v32, %v959_v31 }
  0x44   : > { %1412 = vmatpush3.bf16.msra.mxu0 %v1411_v36  ;;  %v1492_v36 = vpack.c.bf16 %v962_v35, %v961_v34 }
  0x45   : > { %1436 = vmatpush3.bf16.msra.mxu1 %v1435_v37  ;;  %1437 = vmatprep.subr.bf16.mxu0 %v1528_v3  ;;  %v963_v37 = vld [vmem:[%s1995_s1 + $0x330] sm:$0xff] }
  0x46   : > { %1461 = vmatprep.subr.bf16.mxu1 %v1528_v3  ;;  %v1495_v39 = vpack.c.bf16 %v964_v38, %v963_v37 }
  0x47   : > { %1199 = vmatmul.mubr.f32.vlgmr.msra.gmra.mrb[2].mxu0 %v888_v42  ;;  %v967_v42 = vld [vmem:[%s1995_s1 + $0x350] sm:$0xff] }
  0x48   : > { %1439 = vmatpush3.bf16.msra.mxu0 %v1438_v43  ;;  %1234 = vmatmul.mubr.f32.vlgmr.msra.gmra.mrb[2].mxu1 %v905_v44  ;;  %v968_v43 = vld [vmem:[%s1995_s1 + $0x358] sm:$0xff] }
  0x49   : > { %1463 = vmatpush3.bf16.msra.mxu1 %v1462_v45  ;;  %1440 = vmatprep.subr.bf16.mxu0 %v1528_v3  ;;  %v1501_v44 = vpack.c.bf16 %v968_v43, %v967_v42  ;;  %v969_v45 = vld [vmem:[%s1995_s1 + $0x360] sm:$0xff] }
  0x4a   : > { %1464 = vmatprep.subr.bf16.mxu1 %v1528_v3  ;;  %1268 = vmatprep.mubr.msk.f32.mxu0 %vm1529_vm0, %v1530_v11  ;;  %v1504_v47 = vpack.c.bf16 %v970_v46, %v969_v45 }
  0x4b   : > { %1303 = vmatprep.mubr.msk.f32.mxu1 %vm1529_vm0, %v1530_v11 }
  0x4c   : > { %1442 = vmatpush3.bf16.msra.mxu0 %v1441_v50  ;;  %v1507_v50 = vpack.c.bf16 %v972_v49, %v971_v48 }
  0x4d   : > { %1466 = vmatpush3.bf16.msra.mxu1 %v1465_v51  ;;  %1443 = vmatprep.subr.bf16.mxu0 %v1528_v3  ;;  %v956_v51 = vld [vmem:[%s1684_s4 + $0x6] ss:$2 sm:$0xf] }
  0x4e   : > { %1467 = vmatprep.subr.bf16.mxu1 %v1528_v3 }
  0x50   : > { %1445 = vmatpush3.bf16.msra.mxu0 %v1444_v56 }
  0x51   : > { %1469 = vmatpush3.bf16.msra.mxu1 %v1468_v57  ;;  %1446 = vmatprep.subr.bf16.mxu0 %v1528_v3 }
  0x52   : > { %1470 = vmatprep.subr.bf16.mxu1 %v1528_v3 }
  0x54   : > { %1448 = vmatpush3.bf16.msra.mxu0 %v1447_v62 }
  0x55   : > { %1472 = vmatpush3.bf16.msra.mxu1 %v1471_v63  ;;  %1449 = vmatprep.subr.bf16.mxu0 %v1528_v3 }
  0x56   : > { %1473 = vmatprep.subr.bf16.mxu1 %v1528_v3 }
  0x58   : > { %1451 = vmatpush3.bf16.msra.mxu0 %v1450_v5 }
  0x59   : > { %1475 = vmatpush3.bf16.msra.mxu1 %v1474_v6  ;;  %1452 = vmatprep.subr.bf16.mxu0 %v1528_v3  ;;  %v973_v6 = vld [vmem:[%s1996_s2] ss:$0 sm:$0xff] }
  0x5a   : > { %1476 = vmatprep.subr.bf16.mxu1 %v1528_v3 }
  0x5c   : > { %1454 = vmatpush3.bf16.msra.mxu0 %v1453_v12 }
  0x5d   : > { %1478 = vmatpush3.bf16.msra.mxu1 %v1477_v13  ;;  %1455 = vmatprep.subr.bf16.mxu0 %v1528_v3 }
  0x5e   : > { %1479 = vmatprep.subr.bf16.mxu1 %v1528_v3 }
  0x60   : > { %1457 = vmatpush3.bf16.msra.mxu0 %v1456_v18 }
  0x61   : > { %1481 = vmatpush3.bf16.msra.mxu1 %v1480_v19  ;;  %1458 = vmatprep.subr.bf16.mxu0 %v1528_v3 }
  0x62   : > { %1482 = vmatprep.subr.bf16.mxu1 %v1528_v3 }
  0x64   : > { %1460 = vmatpush3.bf16.msra.mxu0 %v1459_v24 }
  0x65   : > { %1484 = vmatpush3.bf16.msra.mxu1 %v1483_v25  ;;  %1485 = vmatprep.subr.bf16.mxu0 %v1528_v3 }
  0x67   : > { %1269 = vmatmul.mubr.f32.vlgmr.msra.gmra.mrb[4].mxu0 %v922_v28 }
  0x68   : > { %1487 = vmatpush3.bf16.msra.mxu0 %v1486_v29  ;;  %1304 = vmatmul.mubr.f32.vlgmr.msra.gmra.mrb[4].mxu1 %v939_v30 }
  0x69   : > { %1488 = vmatprep.subr.bf16.mxu0 %v1528_v3  ;;  %1338 = vmatprep.mubr.msk.f32.mxu0 %vm1529_vm0, %v1530_v11  ;;  %v965_v11 = vld [vmem:[%s1995_s1 + $0x340] sm:$0xff] }
  0x6a   : > { %v1498_v41 = vpack.c.bf16 %v966_v40, %v965_v11 }
  0x6c   : > { %1490 = vmatpush3.bf16.msra.mxu0 %v1489_v33 }
  0x6d   : > { %1491 = vmatprep.subr.bf16.mxu0 %v1528_v3 }
  0x70   : > { %1493 = vmatpush3.bf16.msra.mxu0 %v1492_v36 }
  0x71   : > { %1494 = vmatprep.subr.bf16.mxu0 %v1528_v3 }
  0x74   : > { %1496 = vmatpush3.bf16.msra.mxu0 %v1495_v39 }
  0x75   : > { %1497 = vmatprep.subr.bf16.mxu0 %v1528_v3 }
  0x78   : > { %1499 = vmatpush3.bf16.msra.mxu0 %v1498_v41 }
  0x79   : > { %1500 = vmatprep.subr.bf16.mxu0 %v1528_v3 }
  0x7c   : > { %1502 = vmatpush3.bf16.msra.mxu0 %v1501_v44 }
  0x7d   : > { %1503 = vmatprep.subr.bf16.mxu0 %v1528_v3 }
  0x80   : > { %1505 = vmatpush3.bf16.msra.mxu0 %v1504_v47 }
  0x81   : > { %1506 = vmatprep.subr.bf16.mxu0 %v1528_v3 }
  0x84   : > { %1508 = vmatpush3.bf16.msra.mxu0 %v1507_v50 }
  0x87   : > { %1339 = vmatmul.mubr.f32.vlgmr.msra.gmra.mrb[6].mxu0 %v956_v51 }
  0xfa   : > { %v271_v52 = vpop.f32.mrb[0].mxu0 }
  0xfb   : > { %v1130_v53 = vpop.f32.mrb[1].mxu0  ;;  %v341_v54 = vpop.f32.mrb[0].mxu1 }
  0xfc   : > { %v342_v55 = vadd.f32 %v341_v54, %v271_v52  ;;  %v1165_v56 = vpop.f32.mrb[1].mxu1 }
 0x11a   : > { %v430_v57 = vpop.f32.mrb[2].mxu0 }
 0x11b   : > { %v434_v58 = vadd.f32 %v430_v57, %v342_v55  ;;  %v1200_v59 = vpop.f32.mrb[3].mxu0  ;;  %v520_v60 = vpop.f32.mrb[2].mxu1 }
 0x11c   : > { %v1235_v61 = vpop.f32.mrb[3].mxu1 }
 0x11d   : > { %v524_v62 = vadd.f32 %v520_v60, %v434_v58 }
 0x13a   : > { %v610_v63 = vpop.f32.mrb[4].mxu0 }
 0x13b   : > { %v614_v0 = vadd.f32 %v610_v63, %v524_v62  ;;  %v1270_v1 = vpop.f32.mrb[5].mxu0  ;;  %v700_v2 = vpop.f32.mrb[4].mxu1 }
 0x13c   : > { %v1305_v3 = vpop.f32.mrb[5].mxu1 }
 0x13d   : > { %v704_v4 = vadd.f32 %v700_v2, %v614_v0 }
 0x15a   : > { %v790_v5 = vpop.f32.mrb[6].mxu0 }
 0x15b   : > { %v794_v7 = vadd.f32 %v790_v5, %v704_v4  ;;  %v1340_v8 = vpop.f32.mrb[7].mxu0 }
 0x15d   : > { %v802_v9 = vadd.f32 %v973_v6, %v794_v7 }
 0x15f   : > { %v803_v10 = vmax.f32 %v802_v9, 0.0 }
 0x161   : > { %804 = vst [vmem:[#allocation2] sm:$0xf] %v803_v10 }
 0x168   : > { %v805_v12 = vld [vmem:[#allocation2] ss:$2 sm:$0x3]  ;;  %v807_v13 = vld [vmem:[#allocation2 + $0x1] ss:$2 sm:$0x3] }
 0x169   : > { %v808_v14 = vmax.f32 %v805_v12, %v807_v13 }
 0x16b   : > { %809 = vst [vmem:[%s168_s27] sm:$0x3] %v808_v14 }
 0x16c PF: > { %s13_s12 = sadd.s32 1, %s1526_s12  }
 0x16d   : > { %p10_p4 = scmp.ge.s32.totalorder %s13_s12, 4  }
 0x16f   :  { %12 = sbr.rel (!%p10_p4) target bundleno = 1 (0x1), region = 75 }

</bundles_post_ra>
